<compile_context>
chip_gen: v5e
topology: v5e:2x2
jax: 0.10.0
libtpu: 0.0.40
codegen_flags: <defaults>
</compile_context>

<pallas_src>
import functools
import numpy as np
import jax
import jax.numpy as jnp
from jax.experimental import pallas as pl
from jax.experimental.pallas import tpu as pltpu

USER_DIM = 32
ITEM_DIM = 32
WORD_DIM = 100
CAT_DIM = 8
BRAND_DIM = 8
CONV_OUT = 50
HID1 = 128
HID2 = 64
BN_EPS = 1e-5
COMBINED_DIM = USER_DIM + ITEM_DIM + 3 * CONV_OUT + CAT_DIM + BRAND_DIM  # 230

# Lane-dense padded layout constants.
E_PAD = 128                 # word-emb channels padded 100 -> 128
ONE_CH = WORD_DIM           # constant-ones channel (folds conv biases into matmul)
CP = 64                     # per-tap conv channels padded 50 -> 64
KERNEL_SIZES = (3, 4, 5)
N_TAPS = sum(KERNEL_SIZES)  # 12
CONV_COLS = N_TAPS * CP     # 768 (multiple of 128)
SIDE_DIM = USER_DIM + ITEM_DIM + CAT_DIM + BRAND_DIM  # 80
SIDE_PAD = 128
POOL_PAD = 3 * CP           # 192


def _rating_kernel(side_ref, text_ref, wconv_ref,
                   w1s_ref, w1p_ref, s1_ref, t1_ref,
                   w2_ref, s2_ref, t2_ref, w3_ref, b3_ref,
                   out_ref, *, l_true):
    TB, Lp, _ = text_ref.shape

    # One fused bf16 MXU matmul (f32 accumulation) for all 12 conv taps; the
    # conv biases ride in via the constant-ones channel of the text tile.
    text2d = text_ref[...].reshape(TB * Lp, E_PAD)
    proj = jnp.dot(text2d, wconv_ref[...], preferred_element_type=jnp.float32)
    proj = proj.reshape(TB, Lp, CONV_COLS)

    # Time-position index: built ONCE per grid step, reused for k = 3, 4, 5.
    t_idx = jax.lax.broadcasted_iota(jnp.int32, (TB, Lp, CP), 1)

    def conv_relu_maxpool(col0, k):
        # Recombine per-tap projections with aligned sublane rolls (XLU slot,
        # which has slack under the MXU-bound matmul) instead of misaligned
        # shifted slices.
        acc = proj[:, :, col0:col0 + CP]
        for j in range(1, k):
            tap = proj[:, :, col0 + j * CP: col0 + (j + 1) * CP]
            acc = acc + pltpu.roll(tap, shift=Lp - j, axis=1)   # result[t] = tap[t + j]
        acc = jnp.maximum(acc, 0.0)          # bias already inside proj (ones channel)
        # Unconditional mask: drops positions past the true length AND the roll
        # wrap-around rows (both live at t > l_true - k); safe post-ReLU (>= 0).
        acc = jnp.where(t_idx <= l_true - k, acc, 0.0)
        return jnp.max(acc, axis=1)          # (TB, CP)

    p3 = conv_relu_maxpool(0 * CP, 3)
    p4 = conv_relu_maxpool(3 * CP, 4)
    p5 = conv_relu_maxpool(7 * CP, 5)

    # fc1: one aligned K=128 matmul for side features + three aligned K=64
    # matmuls for the pooled conv features (weight splits are 64-row aligned).
    w1p = w1p_ref[...]
    x1 = (jnp.dot(side_ref[...], w1s_ref[...], preferred_element_type=jnp.float32)
          + jnp.dot(p3, w1p[0 * CP:1 * CP], preferred_element_type=jnp.float32)
          + jnp.dot(p4, w1p[1 * CP:2 * CP], preferred_element_type=jnp.float32)
          + jnp.dot(p5, w1p[2 * CP:3 * CP], preferred_element_type=jnp.float32))
    h1 = jnp.maximum(x1 * s1_ref[...] + t1_ref[...], 0.0)   # fc1 bias + BN1 folded

    x2 = jnp.dot(h1, w2_ref[...], preferred_element_type=jnp.float32)
    h2 = jnp.maximum(x2 * s2_ref[...] + t2_ref[...], 0.0)   # fc2 bias + BN2 folded

    # fc_out as (1, HID2) x (TB, HID2)^T so the output store is lane-dense (1, TB).
    logits = jax.lax.dot_general(
        w3_ref[...], h2, dimension_numbers=(((1,), (1,)), ((), ())),
        preferred_element_type=jnp.float32) + b3_ref[...]
    out_ref[...] = 1.0 + 4.0 * jax.nn.sigmoid(logits)


def prepare_kernel_params(params):
    f32 = jnp.float32

    # Word-emb table padded 100 -> 128 channels with the constant-ones bias
    # channel baked in, stored as bf16 (the fused conv matmul operand dtype).
    # Doing this once here removes two full per-call HBM passes over the text
    # activation (channel pad + ones scatter) and the per-call bf16 cast.
    vocab = params['word_emb'].shape[0]
    word_pad = jnp.concatenate(
        [params['word_emb'].astype(f32),
         jnp.ones((vocab, 1), f32),
         jnp.zeros((vocab, E_PAD - WORD_DIM - 1), f32)],
        axis=1).astype(jnp.bfloat16)

    # Fused conv weight (E_PAD, 768): columns [tap*CP : tap*CP+CONV_OUT] hold the
    # tap weights; row ONE_CH of each conv's tap-0 block holds that conv's bias.
    wconv = np.zeros((E_PAD, CONV_COLS), np.float32)
    tap = 0
    for (wname, bname, k) in (('wc3', 'bc3', 3), ('wc4', 'bc4', 4), ('wc5', 'bc5', 5)):
        w = np.asarray(params[wname], np.float32)            # (k, WORD_DIM, CONV_OUT)
        b = np.asarray(params[bname], np.float32).reshape(-1)
        for j in range(k):
            col = (tap + j) * CP
            wconv[:WORD_DIM, col:col + CONV_OUT] = w[j]
            if j == 0:
                wconv[ONE_CH, col:col + CONV_OUT] = b
        tap += k

    # Split & zero-pad fc1 weight host-side (all kernel-side slices stay aligned).
    w1 = np.asarray(params['w1'], np.float32)                # (230, 128)
    w1_side = np.zeros((SIDE_PAD, HID1), np.float32)
    w1_side[0:32] = w1[0:32]                                  # user
    w1_side[32:64] = w1[32:64]                                # item
    w1_side[64:72] = w1[214:222]                              # cat
    w1_side[72:80] = w1[222:230]                              # brand
    w1_pool = np.zeros((POOL_PAD, HID1), np.float32)
    w1_pool[0:CONV_OUT] = w1[64:114]                          # p3
    w1_pool[CP:CP + CONV_OUT] = w1[114:164]                   # p4
    w1_pool[2 * CP:2 * CP + CONV_OUT] = w1[164:214]           # p5

    # Fold eval-mode BatchNorm + linear biases into per-feature scale/shift.
    s1 = params['bn1_gamma'] / jnp.sqrt(params['bn1_var'] + BN_EPS)
    t1 = params['bn1_beta'] - params['bn1_mean'] * s1 + params['b1'].reshape(-1) * s1
    s2 = params['bn2_gamma'] / jnp.sqrt(params['bn2_var'] + BN_EPS)
    t2 = params['bn2_beta'] - params['bn2_mean'] * s2 + params['b2'].reshape(-1) * s2

    return dict(
        word_emb_pad=word_pad,
        wconv=jnp.asarray(wconv).astype(jnp.bfloat16),        # bf16 MXU operand
        w1_side=jnp.asarray(w1_side), w1_pool=jnp.asarray(w1_pool),
        s1=s1.reshape(1, HID1).astype(f32), t1=t1.reshape(1, HID1).astype(f32),
        w2=params['w2'].astype(f32),
        s2=s2.reshape(1, HID2).astype(f32), t2=t2.reshape(1, HID2).astype(f32),
        w3=params['w3'].T.astype(f32),                        # (1, HID2)
        b3=params['b3'].astype(f32),                          # (1, 1)
    )


def _vmem_budget():
    """Generation-aware (working-set cap, vmem_limit_bytes, TB ceiling)."""
    cap = None
    try:
        cap = getattr(pltpu.get_tpu_info(), 'vmem_capacity_bytes', None)
    except Exception:
        cap = None
    if cap is None:
        cap = 64 * 1024 * 1024                       # conservative (v7x-sized)
    if cap >= 100 * 1024 * 1024:                     # v5e / v6e: 128 MiB VMEM
        return 56 * 1024 * 1024, 96 * 1024 * 1024, 256
    return 24 * 1024 * 1024, 48 * 1024 * 1024, 128   # v7x: 64 MiB VMEM


def _choose_batch_tile(B, Lp, work_cap, tb_max):
    # Per-row working set: double-buffered bf16 text tile + f32 fused-conv
    # projection + conv accumulators / rolled temporaries.
    bytes_per_row = Lp * (2 * E_PAD * 2 + CONV_COLS * 4 + 6 * CP * 4) + 2 * SIDE_PAD * 4
    fixed = 2 * 1024 * 1024          # resident (double-buffered) weights + slack
    cap = max(8, ((work_cap - fixed) // max(bytes_per_row, 1)) // 8 * 8)
    b_pad8 = ((B + 7) // 8) * 8
    tb = max(8, min(tb_max, cap, b_pad8))
    # Keep >= 2 grid steps when possible so v7x's two TensorCores both get work
    # under the "parallel" grid axis (a harmless extra ~0.35 us step elsewhere).
    if tb >= b_pad8 and b_pad8 >= 16:
        tb = max(8, (((b_pad8 + 1) // 2 + 7) // 8) * 8)
    return tb


def rating_predictor_forward(params, user_ids, item_ids, text_seq, cat_ids, brand_ids):
    kp = prepare_kernel_params(params)

    # Embedding lookups (data-dependent gathers) stay in plain JAX glue.
    # TODO(synk): if the XLA word-emb gather shows up as HBM-bound, move it
    # in-kernel (scalar-prefetched token ids + manual DMA from HBM) so the
    # (B, L, 128) text activation never hits HBM.
    user_vec = params['user_emb'][user_ids]
    item_vec = params['item_emb'][item_ids]
    cat_vec = params['cat_emb'][cat_ids]
    brand_vec = params['brand_emb'][brand_ids]
    text = kp['word_emb_pad'][text_seq]        # (B, L, E_PAD) bf16, ones channel baked in

    B, L0, _ = text.shape
    Lp = ((L0 + 7) // 8) * 8
    work_cap, vmem_limit, tb_max = _vmem_budget()
    TB = _choose_batch_tile(B, Lp, work_cap, tb_max)
    B_pad = ((B + TB - 1) // TB) * TB
    num_tiles = B_pad // TB

    # Lane-dense side features: [user, item, cat, brand] padded 80 -> 128.
    side = jnp.concatenate([user_vec, item_vec, cat_vec, brand_vec], axis=1)
    side = jnp.pad(side, ((0, B_pad - B), (0, SIDE_PAD - SIDE_DIM))).astype(jnp.float32)

    # Text: pad time to multiple of 8 and batch to B_pad (channels already 128
    # and ones channel already set inside the padded embedding table).
    text = jnp.pad(text, ((0, B_pad - B), (0, Lp - L0), (0, 0)))

    weights = (kp['wconv'], kp['w1_side'], kp['w1_pool'], kp['s1'], kp['t1'],
               kp['w2'], kp['s2'], kp['t2'], kp['w3'], kp['b3'])

    def _row_spec(shape):
        nd = len(shape)
        return pl.BlockSpec(shape, lambda i, nd=nd: (i,) + (0,) * (nd - 1))

    def _const_spec(shape):
        nd = len(shape)
        return pl.BlockSpec(shape, lambda i, nd=nd: (0,) * nd)

    out = pl.pallas_call(
        functools.partial(_rating_kernel, l_true=L0),
        grid=(num_tiles,),
        in_specs=[_row_spec((TB, SIDE_PAD)), _row_spec((TB, Lp, E_PAD))]
                 + [_const_spec(w.shape) for w in weights],
        out_specs=pl.BlockSpec((1, TB), lambda i: (i, 0)),
        out_shape=jax.ShapeDtypeStruct((num_tiles, TB), jnp.float32),
        compiler_params=pltpu.CompilerParams(
            dimension_semantics=("parallel",),
            vmem_limit_bytes=vmem_limit),
    )(side, text, *weights)

    return out.reshape(B_pad)[:B]                             # matches torch .squeeze(1)


def forward_ref(params, user_ids, item_ids, text_seq, cat_ids, brand_ids):
    """Pure-JAX f32 reference mirroring the PyTorch forward (eval mode)."""
    user = params['user_emb'][user_ids]
    item = params['item_emb'][item_ids]
    text = params['word_emb'][text_seq]
    cat = params['cat_emb'][cat_ids]
    brand = params['brand_emb'][brand_ids]
    B, L, E = text.shape

    def conv_pool(w, b, k):
        Lk = L - k + 1
        acc = jnp.zeros((B, Lk, CONV_OUT), jnp.float32)
        for j in range(k):
            acc = acc + jnp.einsum('ble,eo->blo', text[:, j:j + Lk, :], w[j])
        acc = jnp.maximum(acc + b, 0.0)
        return jnp.max(acc, axis=1)

    p3 = conv_pool(params['wc3'], params['bc3'], 3)
    p4 = conv_pool(params['wc4'], params['bc4'], 4)
    p5 = conv_pool(params['wc5'], params['bc5'], 5)
    combined = jnp.concatenate([user, item, p3, p4, p5, cat, brand], axis=1)

    s1 = params['bn1_gamma'] / jnp.sqrt(params['bn1_var'] + BN_EPS)
    t1 = params['bn1_beta'] - params['bn1_mean'] * s1
    s2 = params['bn2_gamma'] / jnp.sqrt(params['bn2_var'] + BN_EPS)
    t2 = params['bn2_beta'] - params['bn2_mean'] * s2

    h1 = jnp.maximum((combined @ params['w1'] + params['b1']) * s1 + t1, 0.0)
    h2 = jnp.maximum((h1 @ params['w2'] + params['b2']) * s2 + t2, 0.0)
    logits = h2 @ params['w3'] + params['b3']
    return (1.0 + 4.0 * jax.nn.sigmoid(logits))[:, 0]


def init_params(key, num_users, num_items, vocab_size, num_cats, num_brands):
    ks = jax.random.split(key, 32)

    def nrm(k, shape, scale=0.1):
        return (scale * jax.random.normal(k, shape)).astype(jnp.float32)

    p = {}
    p['user_emb'] = nrm(ks[0], (num_users, USER_DIM))
    p['item_emb'] = nrm(ks[1], (num_items, ITEM_DIM))
    p['word_emb'] = nrm(ks[2], (vocab_size, WORD_DIM))
    p['cat_emb'] = nrm(ks[3], (num_cats, CAT_DIM))
    p['brand_emb'] = nrm(ks[4], (num_brands, BRAND_DIM))
    # Conv1d weights: PyTorch (C_out, C_in, k) stored here as (k, C_in, C_out).
    p['wc3'] = nrm(ks[5], (3, WORD_DIM, CONV_OUT))
    p['bc3'] = nrm(ks[6], (1, 1, CONV_OUT), 0.02)
    p['wc4'] = nrm(ks[7], (4, WORD_DIM, CONV_OUT))
    p['bc4'] = nrm(ks[8], (1, 1, CONV_OUT), 0.02)
    p['wc5'] = nrm(ks[9], (5, WORD_DIM, CONV_OUT))
    p['bc5'] = nrm(ks[10], (1, 1, CONV_OUT), 0.02)
    # Linear weights stored as (in, out) == PyTorch weight.T
    p['w1'] = nrm(ks[11], (COMBINED_DIM, HID1))
    p['b1'] = nrm(ks[12], (1, HID1), 0.02)
    p['w2'] = nrm(ks[13], (HID1, HID2))
    p['b2'] = nrm(ks[14], (1, HID2), 0.02)
    p['w3'] = nrm(ks[15], (HID2, 1))
    p['b3'] = nrm(ks[16], (1, 1), 0.02)
    # BatchNorm (eval mode) parameters / running stats.
    p['bn1_gamma'] = 1.0 + nrm(ks[17], (HID1,), 0.05)
    p['bn1_beta'] = nrm(ks[18], (HID1,), 0.05)
    p['bn1_mean'] = nrm(ks[19], (HID1,), 0.05)
    p['bn1_var'] = 1.0 + jnp.abs(nrm(ks[20], (HID1,), 0.05))
    p['bn2_gamma'] = 1.0 + nrm(ks[21], (HID2,), 0.05)
    p['bn2_beta'] = nrm(ks[22], (HID2,), 0.05)
    p['bn2_mean'] = nrm(ks[23], (HID2,), 0.05)
    p['bn2_var'] = 1.0 + jnp.abs(nrm(ks[24], (HID2,), 0.05))
    return p


if __name__ == "__main__":
    key = jax.random.PRNGKey(0)

    B = 2
    MAX_SEQ_LEN = 8
    NUM_USERS = 16
    NUM_ITEMS = 24
    VOCAB_SIZE = 64
    NUM_CATS = 6
    NUM_BRANDS = 9

    pkey, k_u, k_i, k_t, k_c, k_b = jax.random.split(key, 6)
    params = init_params(pkey, NUM_USERS, NUM_ITEMS, VOCAB_SIZE, NUM_CATS, NUM_BRANDS)

    user_ids = jax.random.randint(k_u, (B,), 0, NUM_USERS, dtype=jnp.int32)
    item_ids = jax.random.randint(k_i, (B,), 0, NUM_ITEMS, dtype=jnp.int32)
    text_seq = jax.random.randint(k_t, (B, MAX_SEQ_LEN), 0, VOCAB_SIZE, dtype=jnp.int32)
    cat_ids = jax.random.randint(k_c, (B,), 0, NUM_CATS, dtype=jnp.int32)
    brand_ids = jax.random.randint(k_b, (B,), 0, NUM_BRANDS, dtype=jnp.int32)

    out = rating_predictor_forward(params, user_ids, item_ids, text_seq, cat_ids, brand_ids)
    out = jax.block_until_ready(out)

    ref = forward_ref(params, user_ids, item_ids, text_seq, cat_ids, brand_ids)
    np.testing.assert_allclose(np.asarray(out), np.asarray(ref), rtol=2e-3, atol=2e-3)

    assert out.shape == (B,)
    print("KERNEL_OK")
</pallas_src>

<mosaic_0001>
module attributes {stable_mosaic.version = 11 : i64} {
  func.func @_rating_kernel(%arg0: i32, %arg1: memref<8x128xf32, #tpu.memory_space<vmem>>, %arg2: memref<8x8x128xbf16, #tpu.memory_space<vmem>>, %arg3: memref<128x768xbf16, #tpu.memory_space<vmem>>, %arg4: memref<128x128xf32, #tpu.memory_space<vmem>>, %arg5: memref<192x128xf32, #tpu.memory_space<vmem>>, %arg6: memref<1x128xf32, #tpu.memory_space<vmem>>, %arg7: memref<1x128xf32, #tpu.memory_space<vmem>>, %arg8: memref<128x64xf32, #tpu.memory_space<vmem>>, %arg9: memref<1x64xf32, #tpu.memory_space<vmem>>, %arg10: memref<1x64xf32, #tpu.memory_space<vmem>>, %arg11: memref<1x64xf32, #tpu.memory_space<vmem>>, %arg12: memref<1x1xf32, #tpu.memory_space<vmem>>, %arg13: memref<1x8xf32, #tpu.memory_space<vmem>>) attributes {dimension_semantics = [#tpu.dimension_semantics<parallel>], iteration_bounds = array<i64: 1>, scalar_prefetch = 0 : i64, scratch_operands = 0 : i64, tpu.core_type = #tpu.core_type<tc>, window_params = [{transform_indices = @transform_0, window_bounds = array<i64: 8, 128>}, {transform_indices = @transform_1, window_bounds = array<i64: 8, 8, 128>}, {pipeline_mode = #tpu.pipeline_mode<synchronous>, transform_indices = @transform_2, window_bounds = array<i64: 128, 768>}, {pipeline_mode = #tpu.pipeline_mode<synchronous>, transform_indices = @transform_3, window_bounds = array<i64: 128, 128>}, {pipeline_mode = #tpu.pipeline_mode<synchronous>, transform_indices = @transform_4, window_bounds = array<i64: 192, 128>}, {pipeline_mode = #tpu.pipeline_mode<synchronous>, transform_indices = @transform_5, window_bounds = array<i64: 1, 128>}, {pipeline_mode = #tpu.pipeline_mode<synchronous>, transform_indices = @transform_6, window_bounds = array<i64: 1, 128>}, {pipeline_mode = #tpu.pipeline_mode<synchronous>, transform_indices = @transform_7, window_bounds = array<i64: 128, 64>}, {pipeline_mode = #tpu.pipeline_mode<synchronous>, transform_indices = @transform_8, window_bounds = array<i64: 1, 64>}, {pipeline_mode = #tpu.pipeline_mode<synchronous>, transform_indices = @transform_9, window_bounds = array<i64: 1, 64>}, {pipeline_mode = #tpu.pipeline_mode<synchronous>, transform_indices = @transform_10, window_bounds = array<i64: 1, 64>}, {pipeline_mode = #tpu.pipeline_mode<synchronous>, transform_indices = @transform_11, window_bounds = array<i64: 1, 1>}, {transform_indices = @transform_12, window_bounds = array<i64: 1, 8>}]} {
    %c0 = arith.constant 0 : index
    %c0_0 = arith.constant 0 : index
    %c0_1 = arith.constant 0 : index
    %0 = vector.load %arg2[%c0, %c0_0, %c0_1] : memref<8x8x128xbf16, #tpu.memory_space<vmem>>, vector<8x8x128xbf16>
    %1 = vector.shape_cast %0 : vector<8x8x128xbf16> to vector<64x128xbf16>
    %c0_2 = arith.constant 0 : index
    %c0_3 = arith.constant 0 : index
    %2 = vector.load %arg3[%c0_2, %c0_3] : memref<128x768xbf16, #tpu.memory_space<vmem>>, vector<128x768xbf16>
    %cst = arith.constant dense<0.000000e+00> : vector<64x768xf32>
    %3 = tpu.matmul %1, %2, %cst {dimension_numbers = #tpu.dot_dimension_numbers<[1], [0], [0], [1], [0, 0, 1, 1], [], []>} : vector<64x128xbf16>, vector<128x768xbf16>, vector<64x768xf32> -> vector<64x768xf32>
    %4 = vector.shape_cast %3 : vector<64x768xf32> to vector<8x8x768xf32>
    %5 = tpu.iota {dimensions = array<i32: 1>} : vector<8x8x64xi32>
    %6 = vector.extract_strided_slice %4 {offsets = [0, 0, 0], sizes = [8, 8, 64], strides = [1, 1, 1]} : vector<8x8x768xf32> to vector<8x8x64xf32>
    %7 = vector.extract_strided_slice %4 {offsets = [0, 0, 64], sizes = [8, 8, 64], strides = [1, 1, 1]} : vector<8x8x768xf32> to vector<8x8x64xf32>
    %c7_i32 = arith.constant 7 : i32
    %8 = tpu.dynamic_rotate %7 by %c7_i32 dim 1 : vector<8x8x64xf32>, i32 -> vector<8x8x64xf32>
    %9 = arith.addf %6, %8 : vector<8x8x64xf32>
    %10 = vector.extract_strided_slice %4 {offsets = [0, 0, 128], sizes = [8, 8, 64], strides = [1, 1, 1]} : vector<8x8x768xf32> to vector<8x8x64xf32>
    %c6_i32 = arith.constant 6 : i32
    %11 = tpu.dynamic_rotate %10 by %c6_i32 dim 1 : vector<8x8x64xf32>, i32 -> vector<8x8x64xf32>
    %12 = arith.addf %9, %11 : vector<8x8x64xf32>
    %cst_4 = arith.constant 0.000000e+00 : f32
    %13 = vector.broadcast %cst_4 : f32 to vector<8x8x64xf32>
    %14 = arith.maximumf %12, %13 : vector<8x8x64xf32>
    %c5_i32 = arith.constant 5 : i32
    %15 = vector.broadcast %c5_i32 : i32 to vector<8x8x64xi32>
    %16 = arith.cmpi sle, %5, %15 : vector<8x8x64xi32>
    %cst_5 = arith.constant 0.000000e+00 : f32
    %17 = vector.broadcast %cst_5 : f32 to vector<8x8x64xf32>
    %18 = arith.select %16, %14, %17 : vector<8x8x64xi1>, vector<8x8x64xf32>
    %cst_6 = arith.constant dense<0xFF800000> : vector<8x64xf32>
    %19 = vector.multi_reduction <maximumf>, %18, %cst_6 [1] : vector<8x8x64xf32> to vector<8x64xf32>
    %20 = vector.extract_strided_slice %4 {offsets = [0, 0, 192], sizes = [8, 8, 64], strides = [1, 1, 1]} : vector<8x8x768xf32> to vector<8x8x64xf32>
    %21 = vector.extract_strided_slice %4 {offsets = [0, 0, 256], sizes = [8, 8, 64], strides = [1, 1, 1]} : vector<8x8x768xf32> to vector<8x8x64xf32>
    %c7_i32_7 = arith.constant 7 : i32
    %22 = tpu.dynamic_rotate %21 by %c7_i32_7 dim 1 : vector<8x8x64xf32>, i32 -> vector<8x8x64xf32>
    %23 = arith.addf %20, %22 : vector<8x8x64xf32>
    %24 = vector.extract_strided_slice %4 {offsets = [0, 0, 320], sizes = [8, 8, 64], strides = [1, 1, 1]} : vector<8x8x768xf32> to vector<8x8x64xf32>
    %c6_i32_8 = arith.constant 6 : i32
    %25 = tpu.dynamic_rotate %24 by %c6_i32_8 dim 1 : vector<8x8x64xf32>, i32 -> vector<8x8x64xf32>
    %26 = arith.addf %23, %25 : vector<8x8x64xf32>
    %27 = vector.extract_strided_slice %4 {offsets = [0, 0, 384], sizes = [8, 8, 64], strides = [1, 1, 1]} : vector<8x8x768xf32> to vector<8x8x64xf32>
    %c5_i32_9 = arith.constant 5 : i32
    %28 = tpu.dynamic_rotate %27 by %c5_i32_9 dim 1 : vector<8x8x64xf32>, i32 -> vector<8x8x64xf32>
    %29 = arith.addf %26, %28 : vector<8x8x64xf32>
    %cst_10 = arith.constant 0.000000e+00 : f32
    %30 = vector.broadcast %cst_10 : f32 to vector<8x8x64xf32>
    %31 = arith.maximumf %29, %30 : vector<8x8x64xf32>
    %c4_i32 = arith.constant 4 : i32
    %32 = vector.broadcast %c4_i32 : i32 to vector<8x8x64xi32>
    %33 = arith.cmpi sle, %5, %32 : vector<8x8x64xi32>
    %cst_11 = arith.constant 0.000000e+00 : f32
    %34 = vector.broadcast %cst_11 : f32 to vector<8x8x64xf32>
    %35 = arith.select %33, %31, %34 : vector<8x8x64xi1>, vector<8x8x64xf32>
    %cst_12 = arith.constant dense<0xFF800000> : vector<8x64xf32>
    %36 = vector.multi_reduction <maximumf>, %35, %cst_12 [1] : vector<8x8x64xf32> to vector<8x64xf32>
    %37 = vector.extract_strided_slice %4 {offsets = [0, 0, 448], sizes = [8, 8, 64], strides = [1, 1, 1]} : vector<8x8x768xf32> to vector<8x8x64xf32>
    %38 = vector.extract_strided_slice %4 {offsets = [0, 0, 512], sizes = [8, 8, 64], strides = [1, 1, 1]} : vector<8x8x768xf32> to vector<8x8x64xf32>
    %c7_i32_13 = arith.constant 7 : i32
    %39 = tpu.dynamic_rotate %38 by %c7_i32_13 dim 1 : vector<8x8x64xf32>, i32 -> vector<8x8x64xf32>
    %40 = arith.addf %37, %39 : vector<8x8x64xf32>
    %41 = vector.extract_strided_slice %4 {offsets = [0, 0, 576], sizes = [8, 8, 64], strides = [1, 1, 1]} : vector<8x8x768xf32> to vector<8x8x64xf32>
    %c6_i32_14 = arith.constant 6 : i32
    %42 = tpu.dynamic_rotate %41 by %c6_i32_14 dim 1 : vector<8x8x64xf32>, i32 -> vector<8x8x64xf32>
    %43 = arith.addf %40, %42 : vector<8x8x64xf32>
    %44 = vector.extract_strided_slice %4 {offsets = [0, 0, 640], sizes = [8, 8, 64], strides = [1, 1, 1]} : vector<8x8x768xf32> to vector<8x8x64xf32>
    %c5_i32_15 = arith.constant 5 : i32
    %45 = tpu.dynamic_rotate %44 by %c5_i32_15 dim 1 : vector<8x8x64xf32>, i32 -> vector<8x8x64xf32>
    %46 = arith.addf %43, %45 : vector<8x8x64xf32>
    %47 = vector.extract_strided_slice %4 {offsets = [0, 0, 704], sizes = [8, 8, 64], strides = [1, 1, 1]} : vector<8x8x768xf32> to vector<8x8x64xf32>
    %c4_i32_16 = arith.constant 4 : i32
    %48 = tpu.dynamic_rotate %47 by %c4_i32_16 dim 1 : vector<8x8x64xf32>, i32 -> vector<8x8x64xf32>
    %49 = arith.addf %46, %48 : vector<8x8x64xf32>
    %cst_17 = arith.constant 0.000000e+00 : f32
    %50 = vector.broadcast %cst_17 : f32 to vector<8x8x64xf32>
    %51 = arith.maximumf %49, %50 : vector<8x8x64xf32>
    %c3_i32 = arith.constant 3 : i32
    %52 = vector.broadcast %c3_i32 : i32 to vector<8x8x64xi32>
    %53 = arith.cmpi sle, %5, %52 : vector<8x8x64xi32>
    %cst_18 = arith.constant 0.000000e+00 : f32
    %54 = vector.broadcast %cst_18 : f32 to vector<8x8x64xf32>
    %55 = arith.select %53, %51, %54 : vector<8x8x64xi1>, vector<8x8x64xf32>
    %cst_19 = arith.constant dense<0xFF800000> : vector<8x64xf32>
    %56 = vector.multi_reduction <maximumf>, %55, %cst_19 [1] : vector<8x8x64xf32> to vector<8x64xf32>
    %c0_20 = arith.constant 0 : index
    %c0_21 = arith.constant 0 : index
    %57 = vector.load %arg5[%c0_20, %c0_21] : memref<192x128xf32, #tpu.memory_space<vmem>>, vector<192x128xf32>
    %c0_22 = arith.constant 0 : index
    %c0_23 = arith.constant 0 : index
    %58 = vector.load %arg1[%c0_22, %c0_23] : memref<8x128xf32, #tpu.memory_space<vmem>>, vector<8x128xf32>
    %c0_24 = arith.constant 0 : index
    %c0_25 = arith.constant 0 : index
    %59 = vector.load %arg4[%c0_24, %c0_25] : memref<128x128xf32, #tpu.memory_space<vmem>>, vector<128x128xf32>
    %cst_26 = arith.constant dense<0.000000e+00> : vector<8x128xf32>
    %60 = tpu.matmul %58, %59, %cst_26 {dimension_numbers = #tpu.dot_dimension_numbers<[1], [0], [0], [1], [0, 0, 1, 1], [], []>} : vector<8x128xf32>, vector<128x128xf32>, vector<8x128xf32> -> vector<8x128xf32>
    %61 = vector.extract_strided_slice %57 {offsets = [0, 0], sizes = [64, 128], strides = [1, 1]} : vector<192x128xf32> to vector<64x128xf32>
    %cst_27 = arith.constant dense<0.000000e+00> : vector<8x128xf32>
    %62 = tpu.matmul %19, %61, %cst_27 {dimension_numbers = #tpu.dot_dimension_numbers<[1], [0], [0], [1], [0, 0, 1, 1], [], []>} : vector<8x64xf32>, vector<64x128xf32>, vector<8x128xf32> -> vector<8x128xf32>
    %63 = arith.addf %60, %62 : vector<8x128xf32>
    %64 = vector.extract_strided_slice %57 {offsets = [64, 0], sizes = [64, 128], strides = [1, 1]} : vector<192x128xf32> to vector<64x128xf32>
    %cst_28 = arith.constant dense<0.000000e+00> : vector<8x128xf32>
    %65 = tpu.matmul %36, %64, %cst_28 {dimension_numbers = #tpu.dot_dimension_numbers<[1], [0], [0], [1], [0, 0, 1, 1], [], []>} : vector<8x64xf32>, vector<64x128xf32>, vector<8x128xf32> -> vector<8x128xf32>
    %66 = arith.addf %63, %65 : vector<8x128xf32>
    %67 = vector.extract_strided_slice %57 {offsets = [128, 0], sizes = [64, 128], strides = [1, 1]} : vector<192x128xf32> to vector<64x128xf32>
    %cst_29 = arith.constant dense<0.000000e+00> : vector<8x128xf32>
    %68 = tpu.matmul %56, %67, %cst_29 {dimension_numbers = #tpu.dot_dimension_numbers<[1], [0], [0], [1], [0, 0, 1, 1], [], []>} : vector<8x64xf32>, vector<64x128xf32>, vector<8x128xf32> -> vector<8x128xf32>
    %69 = arith.addf %66, %68 : vector<8x128xf32>
    %c0_30 = arith.constant 0 : index
    %c0_31 = arith.constant 0 : index
    %70 = vector.load %arg6[%c0_30, %c0_31] : memref<1x128xf32, #tpu.memory_space<vmem>>, vector<1x128xf32>
    %71 = vector.broadcast %70 : vector<1x128xf32> to vector<8x128xf32>
    %72 = arith.mulf %69, %71 : vector<8x128xf32>
    %c0_32 = arith.constant 0 : index
    %c0_33 = arith.constant 0 : index
    %73 = vector.load %arg7[%c0_32, %c0_33] : memref<1x128xf32, #tpu.memory_space<vmem>>, vector<1x128xf32>
    %74 = vector.broadcast %73 : vector<1x128xf32> to vector<8x128xf32>
    %75 = arith.addf %72, %74 : vector<8x128xf32>
    %cst_34 = arith.constant 0.000000e+00 : f32
    %76 = vector.broadcast %cst_34 : f32 to vector<8x128xf32>
    %77 = arith.maximumf %75, %76 : vector<8x128xf32>
    %c0_35 = arith.constant 0 : index
    %c0_36 = arith.constant 0 : index
    %78 = vector.load %arg8[%c0_35, %c0_36] : memref<128x64xf32, #tpu.memory_space<vmem>>, vector<128x64xf32>
    %cst_37 = arith.constant dense<0.000000e+00> : vector<8x64xf32>
    %79 = tpu.matmul %77, %78, %cst_37 {dimension_numbers = #tpu.dot_dimension_numbers<[1], [0], [0], [1], [0, 0, 1, 1], [], []>} : vector<8x128xf32>, vector<128x64xf32>, vector<8x64xf32> -> vector<8x64xf32>
    %c0_38 = arith.constant 0 : index
    %c0_39 = arith.constant 0 : index
    %80 = vector.load %arg9[%c0_38, %c0_39] : memref<1x64xf32, #tpu.memory_space<vmem>>, vector<1x64xf32>
    %81 = vector.broadcast %80 : vector<1x64xf32> to vector<8x64xf32>
    %82 = arith.mulf %79, %81 : vector<8x64xf32>
    %c0_40 = arith.constant 0 : index
    %c0_41 = arith.constant 0 : index
    %83 = vector.load %arg10[%c0_40, %c0_41] : memref<1x64xf32, #tpu.memory_space<vmem>>, vector<1x64xf32>
    %84 = vector.broadcast %83 : vector<1x64xf32> to vector<8x64xf32>
    %85 = arith.addf %82, %84 : vector<8x64xf32>
    %cst_42 = arith.constant 0.000000e+00 : f32
    %86 = vector.broadcast %cst_42 : f32 to vector<8x64xf32>
    %87 = arith.maximumf %85, %86 : vector<8x64xf32>
    %c0_43 = arith.constant 0 : index
    %c0_44 = arith.constant 0 : index
    %88 = vector.load %arg11[%c0_43, %c0_44] : memref<1x64xf32, #tpu.memory_space<vmem>>, vector<1x64xf32>
    %cst_45 = arith.constant dense<0.000000e+00> : vector<1x8xf32>
    %89 = tpu.matmul %88, %87, %cst_45 {dimension_numbers = #tpu.dot_dimension_numbers<[1], [1], [0], [0], [0, 0, 1, 0], [], []>} : vector<1x64xf32>, vector<8x64xf32>, vector<1x8xf32> -> vector<1x8xf32>
    %c0_46 = arith.constant 0 : index
    %c0_47 = arith.constant 0 : index
    %90 = vector.load %arg12[%c0_46, %c0_47] : memref<1x1xf32, #tpu.memory_space<vmem>>, vector<1x1xf32>
    %91 = vector.broadcast %90 : vector<1x1xf32> to vector<1x8xf32>
    %92 = arith.addf %89, %91 : vector<1x8xf32>
    %93 = arith.negf %92 : vector<1x8xf32>
    %94 = math.exp %93 : vector<1x8xf32>
    %cst_48 = arith.constant 1.000000e+00 : f32
    %95 = vector.broadcast %cst_48 : f32 to vector<1x8xf32>
    %96 = arith.addf %95, %94 : vector<1x8xf32>
    %97 = arith.divf %95, %96 : vector<1x8xf32>
    %cst_49 = arith.constant 4.000000e+00 : f32
    %98 = vector.broadcast %cst_49 : f32 to vector<1x8xf32>
    %99 = arith.mulf %98, %97 : vector<1x8xf32>
    %cst_50 = arith.constant 1.000000e+00 : f32
    %100 = vector.broadcast %cst_50 : f32 to vector<1x8xf32>
    %101 = arith.addf %100, %99 : vector<1x8xf32>
    %c0_51 = arith.constant 0 : index
    %c0_52 = arith.constant 0 : index
    %102 = vector.load %arg13[%c0_51, %c0_52] : memref<1x8xf32, #tpu.memory_space<vmem>>, vector<1x8xf32>
    tpu.vector_store %arg13[%c0_51, %c0_52], %101 {strides = array<i32>} : memref<1x8xf32, #tpu.memory_space<vmem>>, vector<1x8xf32>,
    return
  }
  func.func @transform_0(%arg0: i32) -> (i32, i32) {
    %c0_i32 = arith.constant 0 : i32
    %c0_i32_0 = arith.constant 0 : i32
    return %arg0, %c0_i32 : i32, i32
  }
  func.func @transform_1(%arg0: i32) -> (i32, i32, i32) {
    %c0_i32 = arith.constant 0 : i32
    %c0_i32_0 = arith.constant 0 : i32
    %c0_i32_1 = arith.constant 0 : i32
    return %arg0, %c0_i32, %c0_i32_0 : i32, i32, i32
  }
  func.func @transform_2(%arg0: i32) -> (i32, i32) {
    %c0_i32 = arith.constant 0 : i32
    %c0_i32_0 = arith.constant 0 : i32
    %c0_i32_1 = arith.constant 0 : i32
    return %c0_i32, %c0_i32_0 : i32, i32
  }
  func.func @transform_3(%arg0: i32) -> (i32, i32) {
    %c0_i32 = arith.constant 0 : i32
    %c0_i32_0 = arith.constant 0 : i32
    %c0_i32_1 = arith.constant 0 : i32
    return %c0_i32, %c0_i32_0 : i32, i32
  }
  func.func @transform_4(%arg0: i32) -> (i32, i32) {
    %c0_i32 = arith.constant 0 : i32
    %c0_i32_0 = arith.constant 0 : i32
    %c0_i32_1 = arith.constant 0 : i32
    return %c0_i32, %c0_i32_0 : i32, i32
  }
  func.func @transform_5(%arg0: i32) -> (i32, i32) {
    %c0_i32 = arith.constant 0 : i32
    %c0_i32_0 = arith.constant 0 : i32
    %c0_i32_1 = arith.constant 0 : i32
    return %c0_i32, %c0_i32_0 : i32, i32
  }
  func.func @transform_6(%arg0: i32) -> (i32, i32) {
    %c0_i32 = arith.constant 0 : i32
    %c0_i32_0 = arith.constant 0 : i32
    %c0_i32_1 = arith.constant 0 : i32
    return %c0_i32, %c0_i32_0 : i32, i32
  }
  func.func @transform_7(%arg0: i32) -> (i32, i32) {
    %c0_i32 = arith.constant 0 : i32
    %c0_i32_0 = arith.constant 0 : i32
    %c0_i32_1 = arith.constant 0 : i32
    return %c0_i32, %c0_i32_0 : i32, i32
  }
  func.func @transform_8(%arg0: i32) -> (i32, i32) {
    %c0_i32 = arith.constant 0 : i32
    %c0_i32_0 = arith.constant 0 : i32
    %c0_i32_1 = arith.constant 0 : i32
    return %c0_i32, %c0_i32_0 : i32, i32
  }
  func.func @transform_9(%arg0: i32) -> (i32, i32) {
    %c0_i32 = arith.constant 0 : i32
    %c0_i32_0 = arith.constant 0 : i32
    %c0_i32_1 = arith.constant 0 : i32
    return %c0_i32, %c0_i32_0 : i32, i32
  }
  func.func @transform_10(%arg0: i32) -> (i32, i32) {
    %c0_i32 = arith.constant 0 : i32
    %c0_i32_0 = arith.constant 0 : i32
    %c0_i32_1 = arith.constant 0 : i32
    return %c0_i32, %c0_i32_0 : i32, i32
  }
  func.func @transform_11(%arg0: i32) -> (i32, i32) {
    %c0_i32 = arith.constant 0 : i32
    %c0_i32_0 = arith.constant 0 : i32
    %c0_i32_1 = arith.constant 0 : i32
    return %c0_i32, %c0_i32_0 : i32, i32
  }
  func.func @transform_12(%arg0: i32) -> (i32, i32) {
    %c0_i32 = arith.constant 0 : i32
    %c0_i32_0 = arith.constant 0 : i32
    return %arg0, %c0_i32 : i32, i32
  }
}

</mosaic_0001>

<bundles_post_ra>
// kernel: tpu_custom_call.1
= control target key start
LH: loop header
LB: loop body
LE: loop exit
PB: predicated region body
PF: predicated region fallthrough
CT: control target
= control target key end

     0   :  { %s2683_s0 = inlined_call_operand.hbm [shape: f32[8,128], index: 0, kind: input, shape index: {}]   ;;  %s2684_s1 = inlined_call_operand.hbm [shape: bf16[8,8,128], index: 1, kind: input, shape index: {}]   ;;  %s2685_s2 = inlined_call_operand.hbm [shape: bf16[128,768], index: 2, kind: input, shape index: {}]   ;;  %s2686_s3 = inlined_call_operand.hbm [shape: f32[128,128], index: 3, kind: input, shape index: {}]   ;;  %s2687_s4 = inlined_call_operand.vmem [shape: f32[192,128], index: 4, kind: input, shape index: {}]   ;;  %s2688_s5 = inlined_call_operand.vmem [shape: f32[1,128], index: 5, kind: input, shape index: {}]   ;;  %s2689_s6 = inlined_call_operand.vmem [shape: f32[1,128], index: 6, kind: input, shape index: {}]   ;;  %s2690_s7 = inlined_call_operand.vmem [shape: f32[128,64], index: 7, kind: input, shape index: {}]   ;;  %s2691_s8 = inlined_call_operand.vmem [shape: f32[1,64], index: 8, kind: input, shape index: {}]   ;;  %s2692_s9 = inlined_call_operand.vmem [shape: f32[1,64], index: 9, kind: input, shape index: {}]   ;;  %s2693_s10 = inlined_call_operand.vmem [shape: f32[1,64], index: 10, kind: input, shape index: {}]   ;;  %s2694_s11 = inlined_call_operand.<no memory space> [shape: f32[1,1], index: 11, kind: input, shape index: {}]   ;;  %s2695_s12 = inlined_call_operand.hbm [shape: f32[1,8], index: 12, kind: output, shape index: {}]  }
   0x1   :  { %v17_v0 = vstv %s2694_s11 }
   0x2   :  { %18 = vst [vmem:[#allocation2] sm:$0x1] %v17_v0 }
   0x3   :  { %19 = vsyncpa [#allocation4], 0 }
   0x4   :  { %20 = vsyncpa [#allocation7], 0 }
   0x5   :  { %21 = vsyncpa [#allocation10], 0  ;;  %s38_s25 = sshll.u32 %s2684_s1, 4  ;;  %s39_s25 = int_to_ptr.hbm [resolvable:$true] %s38_s25 }
   0x6   :  { %22 = vsyncpa [#allocation5], 0  ;;  %s2052_s26 = smov [#allocation6]   ;;  %s28_s30 = sshll.u32 %s2683_s0, 4  ;;  %s29_s30 = int_to_ptr.hbm [resolvable:$true] %s28_s30 }
   0x7   :  { %s40_s27 = sshll.u32 %s2052_s26, 4  ;;  %s2053_s13 = smov 64   ;;  %s41_s27 = int_to_ptr.vmem [resolvable:$true] %s40_s27 }
   0x8   :  { %s2054_s14 = smov 4   ;;  %s2055_s11 = smov [#allocation3]  }
   0x9   :  { %46 = dma.hbm_to_vmem [thread:$0]  %s39_s25, 512, %s41_s27, [#allocation7], %s2053_s13, %s2053_s13, %s2054_s14  }
   0xa   :  { %s30_s15 = sshll.u32 %s2055_s11, 4  ;;  %s51_s1 = sshll.u32 %s2685_s2, 4  ;;  %s31_s15 = int_to_ptr.vmem [resolvable:$true] %s30_s15  ;;  %s52_s1 = int_to_ptr.hbm [resolvable:$true] %s51_s1 }
   0xb   :  { %33 = dma.hbm_to_vmem [thread:$0]  %s29_s30, 128, %s31_s15, [#allocation4]  }
   0xc   :  { %s2056_s18 = smov [#allocation8]   ;;  %s64_s21 = sshll.u32 %s2686_s3, 4  ;;  %s65_s21 = int_to_ptr.hbm [resolvable:$true] %s64_s21 }
   0xd   :  { %s53_s19 = sshll.u32 %s2056_s18, 4  ;;  %s2057_s22 = smov 384   ;;  %s54_s19 = int_to_ptr.vmem [resolvable:$true] %s53_s19 }
   0xe   :  { %s2058_s23 = smov 24   ;;  %s2059_s24 = smov [#allocation9]  }
   0xf   :  { %59 = dma.hbm_to_vmem [thread:$0]  %s52_s1, 6144, %s54_s19, [#allocation7], %s2057_s22, %s2057_s22, %s2058_s23  }
  0x10   :  { %s66_s25 = sshll.u32 %s2059_s24, 4  ;;  %s2060_s26 = smov 128   ;;  %s67_s25 = int_to_ptr.vmem [resolvable:$true] %s66_s25 }
  0x11   :  { %s2061_s27 = smov 8  }
  0x12   :  { %72 = dma.hbm_to_vmem [thread:$0]  %s65_s21, 2048, %s67_s25, [#allocation10], %s2060_s26, %s2060_s26, %s2061_s27  }
  0x13   :  { %2044 = dma.done.wait [#allocation4], 128  }
  0x14   :  { %2045 = vsyncadd [#allocation4], 4294967168 }
  0x15   :  { %2046 = dma.done.wait [#allocation7], 6656  }
  0x16   :  { %2047 = vsyncadd [#allocation7], 4294960640 }
  0x17   :  { %2048 = dma.done.wait [#allocation10], 2048  }
  0x18   :  { %2049 = vsyncadd [#allocation10], 4294965248  ;;  %v1823_v1 = vld [vmem:[#allocation8 + $0x150] sm:$0xf]  ;;  %v1900_v2 = vld [vmem:[#allocation8 + $0x164] sm:$0xf0] }
  0x19   :  { %v1831_v3 = vld [vmem:[#allocation8 + $0x158] sm:$0xf]  ;;  %v1824_v4 = vor.u32 %v1900_v2, %v1823_v1  ;;  %v1901_v5 = vld [vmem:[#allocation8 + $0x16c] sm:$0xf0]  ;;  %v1799_v6 = vld [vmem:[#allocation8 + $0x120] sm:$0xf] }
  0x1a   :  { %v1894_v7 = vld [vmem:[#allocation8 + $0x134] sm:$0xf0]  ;;  %v1832_v8 = vor.u32 %v1901_v5, %v1831_v3  ;;  %v1807_v9 = vld [vmem:[#allocation8 + $0x128] sm:$0xf]  ;;  %v1895_v10 = vld [vmem:[#allocation8 + $0x13c] sm:$0xf0] }
  0x1b   :  { %v1897_v11 = vld [vmem:[#allocation8 + $0x154] sm:$0xf]  ;;  %425 = vmatpush.bf16.msra.mxu0 %v1824_v4  ;;  %v1800_v12 = vor.u32 %v1894_v7, %v1799_v6  ;;  %v1825_v13 = vld [vmem:[#allocation8 + $0x168] sm:$0xf0]  ;;  %v1898_v14 = vld [vmem:[#allocation8 + $0x15c] sm:$0xf]  ;;  %v1808_v16 = vor.u32 %v1895_v10, %v1807_v9 }
  0x1c   :  { %v1833_v15 = vld [vmem:[#allocation8 + $0x170] sm:$0xf0]  ;;  %483 = vmatpush.bf16.msra.mxu2 %v1832_v8  ;;  %v1828_v17 = vor.u32 %v1897_v11, %v1825_v13  ;;  %v1775_v19 = vld [vmem:[#allocation8 + $0xf0] sm:$0xf]  ;;  %v1888_v20 = vld [vmem:[#allocation8 + $0x104] sm:$0xf0] }
  0x1d   :  { %v1836_v18 = vor.u32 %v1898_v14, %v1833_v15  ;;  %v1783_v21 = vld [vmem:[#allocation8 + $0xf8] sm:$0xf]  ;;  %v1889_v22 = vld [vmem:[#allocation8 + $0x10c] sm:$0xf0]  ;;  %v1891_v23 = vld [vmem:[#allocation8 + $0x124] sm:$0xf]  ;;  %v1776_v28 = vor.u32 %v1888_v20, %v1775_v19 }
  0x1e   :  { %v1801_v24 = vld [vmem:[#allocation8 + $0x138] sm:$0xf0]  ;;  %454 = vmatpush.bf16.msra.mxu1 %v1828_v17  ;;  %v1892_v26 = vld [vmem:[#allocation8 + $0x12c] sm:$0xf]  ;;  %v1809_v27 = vld [vmem:[#allocation8 + $0x140] sm:$0xf0]  ;;  %v1784_v32 = vor.u32 %v1889_v22, %v1783_v21 }
  0x1f   :  { %512 = vmatpush.bf16.msra.mxu3 %v1836_v18  ;;  %v1804_v25 = vor.u32 %v1891_v23, %v1801_v24  ;;  %426 = vmatpush.bf16.msra.mxu0 %v1800_v12  ;;  %v1812_v29 = vor.u32 %v1892_v26, %v1809_v27  ;;  %v1751_v30 = vld [vmem:[#allocation8 + $0xc0] sm:$0xf]  ;;  %v1882_v31 = vld [vmem:[#allocation8 + $0xd4] sm:$0xf0]  ;;  %v1885_v33 = vld [vmem:[#allocation8 + $0xf4] sm:$0xf] }
  0x20   :  { %484 = vmatpush.bf16.msra.mxu2 %v1808_v16  ;;  %v1777_v34 = vld [vmem:[#allocation8 + $0x108] sm:$0xf0]  ;;  %v1886_v35 = vld [vmem:[#allocation8 + $0xfc] sm:$0xf]  ;;  %v1759_v36 = vld [vmem:[#allocation8 + $0xc8] sm:$0xf]  ;;  %v1752_v42 = vor.u32 %v1882_v31, %v1751_v30 }
  0x21   :  { %v1883_v37 = vld [vmem:[#allocation8 + $0xdc] sm:$0xf0]  ;;  %v1785_v38 = vld [vmem:[#allocation8 + $0x110] sm:$0xf0]  ;;  %v1780_v39 = vor.u32 %v1885_v33, %v1777_v34  ;;  %v1879_v41 = vld [vmem:[#allocation8 + $0xc4] sm:$0xf] }
  0x22   :  { %455 = vmatpush.bf16.msra.mxu1 %v1804_v25  ;;  %v1788_v40 = vor.u32 %v1886_v35, %v1785_v38  ;;  %v1753_v43 = vld [vmem:[#allocation8 + $0xd8] sm:$0xf0]  ;;  %v1880_v44 = vld [vmem:[#allocation8 + $0xcc] sm:$0xf]  ;;  %v1761_v45 = vld [vmem:[#allocation8 + $0xe0] sm:$0xf0]  ;;  %v1760_v46 = vor.u32 %v1883_v37, %v1759_v36 }
  0x23   :  { %513 = vmatpush.bf16.msra.mxu3 %v1812_v29  ;;  %427 = vmatpush.bf16.msra.mxu0 %v1776_v28  ;;  %v1727_v47 = vld [vmem:[#allocation8 + $0x90] sm:$0xf]  ;;  %v1876_v48 = vld [vmem:[#allocation8 + $0xa4] sm:$0xf0]  ;;  %v1735_v49 = vld [vmem:[#allocation8 + $0x98] sm:$0xf]  ;;  %v1756_v51 = vor.u32 %v1879_v41, %v1753_v43  ;;  %v1764_v52 = vor.u32 %v1880_v44, %v1761_v45 }
  0x24   :  { %485 = vmatpush.bf16.msra.mxu2 %v1784_v32  ;;  %v1877_v50 = vld [vmem:[#allocation8 + $0xac] sm:$0xf0]  ;;  %v1873_v53 = vld [vmem:[#allocation8 + $0x94] sm:$0xf]  ;;  %v1728_v54 = vor.u32 %v1876_v48, %v1727_v47  ;;  %v1729_v55 = vld [vmem:[#allocation8 + $0xa8] sm:$0xf0] }
  0x25   :  { %v1874_v56 = vld [vmem:[#allocation8 + $0x9c] sm:$0xf]  ;;  %v1737_v57 = vld [vmem:[#allocation8 + $0xb0] sm:$0xf0]  ;;  %v1736_v58 = vor.u32 %v1877_v50, %v1735_v49  ;;  %v1703_v59 = vld [vmem:[#allocation8 + $0x60] sm:$0xf]  ;;  %v1732_v63 = vor.u32 %v1873_v53, %v1729_v55 }
  0x26   :  { %456 = vmatpush.bf16.msra.mxu1 %v1780_v39  ;;  %v1870_v60 = vld [vmem:[#allocation8 + $0x74] sm:$0xf0]  ;;  %v1711_v61 = vld [vmem:[#allocation8 + $0x68] sm:$0xf]  ;;  %v1871_v62 = vld [vmem:[#allocation8 + $0x7c] sm:$0xf0]  ;;  %v1740_v0 = vor.u32 %v1874_v56, %v1737_v57 }
  0x27   :  { %514 = vmatpush.bf16.msra.mxu3 %v1788_v40  ;;  %428 = vmatpush.bf16.msra.mxu0 %v1752_v42  ;;  %v1867_v1 = vld [vmem:[#allocation8 + $0x64] sm:$0xf]  ;;  %v1704_v2 = vor.u32 %v1870_v60, %v1703_v59  ;;  %v1705_v3 = vld [vmem:[#allocation8 + $0x78] sm:$0xf0]  ;;  %v1868_v4 = vld [vmem:[#allocation8 + $0x6c] sm:$0xf]  ;;  %v1712_v6 = vor.u32 %v1871_v62, %v1711_v61 }
  0x28   :  { %486 = vmatpush.bf16.msra.mxu2 %v1760_v46  ;;  %v1713_v5 = vld [vmem:[#allocation8 + $0x80] sm:$0xf0]  ;;  %v1679_v7 = vld [vmem:[#allocation8 + $0x30] sm:$0xf]  ;;  %v1864_v8 = vld [vmem:[#allocation8 + $0x44] sm:$0xf0]  ;;  %v1708_v12 = vor.u32 %v1867_v1, %v1705_v3 }
  0x29   :  { %v1687_v9 = vld [vmem:[#allocation8 + $0x38] sm:$0xf]  ;;  %v1865_v10 = vld [vmem:[#allocation8 + $0x4c] sm:$0xf0]  ;;  %v1861_v11 = vld [vmem:[#allocation8 + $0x34] sm:$0xf]  ;;  %v1716_v13 = vor.u32 %v1868_v4, %v1713_v5  ;;  %v1680_v17 = vor.u32 %v1864_v8, %v1679_v7 }
  0x2a   :  { %457 = vmatpush.bf16.msra.mxu1 %v1756_v51  ;;  %v1681_v14 = vld [vmem:[#allocation8 + $0x48] sm:$0xf0]  ;;  %v1862_v15 = vld [vmem:[#allocation8 + $0x3c] sm:$0xf]  ;;  %v1689_v16 = vld [vmem:[#allocation8 + $0x50] sm:$0xf0]  ;;  %v1688_v18 = vor.u32 %v1865_v10, %v1687_v9 }
  0x2b   :  { %515 = vmatpush.bf16.msra.mxu3 %v1764_v52  ;;  %429 = vmatpush.bf16.msra.mxu0 %v1728_v54  ;;  %v1655_v19 = vld [vmem:[#allocation8] sm:$0xf]  ;;  %v1858_v20 = vld [vmem:[#allocation8 + $0x14] sm:$0xf0]  ;;  %v1663_v21 = vld [vmem:[#allocation8 + $0x8] sm:$0xf]  ;;  %v1684_v23 = vor.u32 %v1861_v11, %v1681_v14  ;;  %v1692_v24 = vor.u32 %v1862_v15, %v1689_v16 }
  0x2c   :  { %487 = vmatpush.bf16.msra.mxu2 %v1736_v58  ;;  %v1859_v22 = vld [vmem:[#allocation8 + $0x1c] sm:$0xf0]  ;;  %v1656_v25 = vor.u32 %v1858_v20, %v1655_v19  ;;  %v1855_v26 = vld [vmem:[#allocation8 + $0x4] sm:$0xf]  ;;  %v1657_v27 = vld [vmem:[#allocation8 + $0x18] sm:$0xf0] }
  0x2d   :  { %v1664_v28 = vor.u32 %v1859_v22, %v1663_v21  ;;  %v1856_v29 = vld [vmem:[#allocation8 + $0xc] sm:$0xf]  ;;  %v1665_v30 = vld [vmem:[#allocation8 + $0x20] sm:$0xf0]  ;;  %v1841_v32 = vld [vmem:[#allocation8 + $0x178] sm:$0xf0]  ;;  %v1660_v34 = vor.u32 %v1855_v26, %v1657_v27 }
  0x2e   :  { %458 = vmatpush.bf16.msra.mxu1 %v1732_v63  ;;  %v1899_v31 = vld [vmem:[#allocation8 + $0x164] sm:$0xf]  ;;  %v1668_v35 = vor.u32 %v1856_v29, %v1665_v30  ;;  %v1839_v37 = vld [vmem:[#allocation8 + $0x160] sm:$0xf]  ;;  %v1902_v38 = vld [vmem:[#allocation8 + $0x174] sm:$0xf0] }
  0x2f   :  { %516 = vmatpush.bf16.msra.mxu3 %v1740_v0  ;;  %430 = vmatpush.bf16.msra.mxu0 %v1704_v2  ;;  %v2146_v33 = vld [vmem:[#allocation6] sm:$0xff]  ;;  %v1844_v36 = vor.u32 %v1899_v31, %v1841_v32  ;;  %v1840_v39 = vor.u32 %v1902_v38, %v1839_v37  ;;  %v1893_v40 = vld [vmem:[#allocation8 + $0x134] sm:$0xf]  ;;  %v1817_v41 = vld [vmem:[#allocation8 + $0x148] sm:$0xf0]  ;;  %vm932_vm1 = vcmask 1048064  }
  0x30   :  { %488 = vmatpush.bf16.msra.mxu2 %v1712_v6  ;;  %v1815_v42 = vld [vmem:[#allocation8 + $0x130] sm:$0xf]  ;;  %v1820_v43 = vor.u32 %v1893_v40, %v1817_v41  ;;  %v1896_v44 = vld [vmem:[#allocation8 + $0x144] sm:$0xf0]  ;;  %v1791_v46 = vld [vmem:[#allocation8 + $0x100] sm:$0xf] }
  0x31   :  { %v1816_v45 = vor.u32 %v1896_v44, %v1815_v42  ;;  %v1890_v47 = vld [vmem:[#allocation8 + $0x114] sm:$0xf0]  ;;  %v1887_v48 = vld [vmem:[#allocation8 + $0x104] sm:$0xf]  ;;  %v1793_v49 = vld [vmem:[#allocation8 + $0x118] sm:$0xf0] }
  0x32   :  { %459 = vmatpush.bf16.msra.mxu1 %v1708_v12  ;;  %v1792_v50 = vor.u32 %v1890_v47, %v1791_v46  ;;  %v1796_v51 = vor.u32 %v1887_v48, %v1793_v49  ;;  %v1767_v52 = vld [vmem:[#allocation8 + $0xd0] sm:$0xf]  ;;  %v1884_v53 = vld [vmem:[#allocation8 + $0xe4] sm:$0xf0]  ;;  %v1743_v56 = vld [vmem:[#allocation8 + $0xa0] sm:$0xf] }
  0x33   :  { %517 = vmatpush.bf16.msra.mxu3 %v1716_v13  ;;  %431 = vmatpush.bf16.msra.mxu0 %v1680_v17  ;;  %v1768_v54 = vor.u32 %v1884_v53, %v1767_v52  ;;  %v1852_v55 = vld [vmem:[#allocation6 + $0x8] sm:$0xff]  ;;  %v1878_v57 = vld [vmem:[#allocation8 + $0xb4] sm:$0xf0]  ;;  %v1881_v59 = vld [vmem:[#allocation8 + $0xd4] sm:$0xf]  ;;  %vm1367_vm2 = vcmask 1041409  }
  0x34   :  { %489 = vmatpush.bf16.msra.mxu2 %v1688_v18  ;;  %v1744_v58 = vor.u32 %v1878_v57, %v1743_v56  ;;  %v1769_v60 = vld [vmem:[#allocation8 + $0xe8] sm:$0xf0]  ;;  %v1719_v61 = vld [vmem:[#allocation8 + $0x70] sm:$0xf]  ;;  %v1872_v63 = vld [vmem:[#allocation8 + $0x84] sm:$0xf0] }
  0x35   :  { %v1772_v62 = vor.u32 %v1881_v59, %v1769_v60  ;;  %v1720_v0 = vor.u32 %v1872_v63, %v1719_v61  ;;  %v1875_v1 = vld [vmem:[#allocation8 + $0xa4] sm:$0xf]  ;;  %v1745_v2 = vld [vmem:[#allocation8 + $0xb8] sm:$0xf0]  ;;  %v1695_v3 = vld [vmem:[#allocation8 + $0x40] sm:$0xf] }
  0x36   :  { %460 = vmatpush.bf16.msra.mxu1 %v1684_v23  ;;  %v1748_v4 = vor.u32 %v1875_v1, %v1745_v2  ;;  %v1866_v5 = vld [vmem:[#allocation8 + $0x54] sm:$0xf0]  ;;  %v1869_v6 = vld [vmem:[#allocation8 + $0x74] sm:$0xf]  ;;  %v1721_v7 = vld [vmem:[#allocation8 + $0x88] sm:$0xf0] }
  0x37   :  { %518 = vmatpush.bf16.msra.mxu3 %v1692_v24  ;;  %432 = vmatpush.bf16.msra.mxu0 %v1656_v25  ;;  %v1696_v8 = vor.u32 %v1866_v5, %v1695_v3  ;;  %v1671_v9 = vld [vmem:[#allocation8 + $0x10] sm:$0xf]  ;;  %v1860_v10 = vld [vmem:[#allocation8 + $0x24] sm:$0xf0]  ;;  %v1724_v11 = vor.u32 %v1869_v6, %v1721_v7  ;;  %v1863_v12 = vld [vmem:[#allocation8 + $0x44] sm:$0xf] }
  0x38   :  { %490 = vmatpush.bf16.msra.mxu2 %v1664_v28  ;;  %v1697_v13 = vld [vmem:[#allocation8 + $0x58] sm:$0xf0]  ;;  %v1672_v14 = vor.u32 %v1860_v10, %v1671_v9  ;;  %v1853_v15 = vld [vmem:[#allocation6 + $0x10] sm:$0xff]  ;;  %v1673_v18 = vld [vmem:[#allocation8 + $0x28] sm:$0xf0]  ;;  %vm1369_vm3 = vcmask 1042434  }
  0x39   :  { %v1700_v16 = vor.u32 %v1863_v12, %v1697_v13  ;;  %v1857_v17 = vld [vmem:[#allocation8 + $0x14] sm:$0xf]  ;;  %v1854_v20 = vld [vmem:[#allocation6 + $0x18] sm:$0xff]  ;;  %vm1371_vm4 = vcmask 1043459   ;;  %vm1373_vm5 = vcmask 1044484   ;;  %vm1375_vm6 = vcmask 1045509  }
  0x3a   :  { %433 = vmatmul.bf16.vlgmr.msra.gmra.mxu0 %v2146_v33  ;;  %461 = vmatpush.bf16.msra.mxu1 %v1660_v34  ;;  %v1676_v19 = vor.u32 %v1857_v17, %v1673_v18  ;;  %vm1377_vm7 = vcmask 1046534   ;;  %vm1379_vm8 = vcmask 1047559   ;;  %vm682_vm11 = vcmask 523264   ;;  %s1625_s23 = sshll.u32 %s2695_s12, 4  ;;  %s1626_s23 = int_to_ptr.hbm [resolvable:$true] %s1625_s23 }
  0x3b   :  { %491 = vmatmul.bf16.vlgmr.msra.gmra.mxu2 %v2146_v33  ;;  %519 = vmatpush.bf16.msra.mxu3 %v1668_v35 }
  0x3c   :  { %541 = vmatpush.bf16.msrb.mxu0 %v1840_v39 }
  0x3d   :  { %462 = vmatmul.bf16.vlgmr.msra.gmra.mxu1 %v2146_v33 }
  0x3e   :  { %570 = vmatpush.bf16.msrb.mxu1 %v1844_v36  ;;  %520 = vmatmul.bf16.vlgmr.msra.gmra.mxu3 %v2146_v33 }
  0x40   :  { %542 = vmatpush.bf16.msrb.mxu0 %v1816_v45 }
  0x42   :  { %571 = vmatpush.bf16.msrb.mxu1 %v1820_v43 }
  0x44   :  { %543 = vmatpush.bf16.msrb.mxu0 %v1792_v50 }
  0x46   :  { %572 = vmatpush.bf16.msrb.mxu1 %v1796_v51 }
  0x48   :  { %544 = vmatpush.bf16.msrb.mxu0 %v1768_v54 }
  0x4a   :  { %438 = vmatmul.bf16.gmra.mxu0 %v1852_v55  ;;  %573 = vmatpush.bf16.msrb.mxu1 %v1772_v62 }
  0x4b   :  { %496 = vmatmul.bf16.gmra.mxu2 %v1852_v55 }
  0x4c   :  { %545 = vmatpush.bf16.msrb.mxu0 %v1744_v58 }
  0x4d   :  { %467 = vmatmul.bf16.gmra.mxu1 %v1852_v55 }
  0x4e   :  { %525 = vmatmul.bf16.gmra.mxu3 %v1852_v55  ;;  %574 = vmatpush.bf16.msrb.mxu1 %v1748_v4 }
  0x50   :  { %546 = vmatpush.bf16.msrb.mxu0 %v1720_v0 }
  0x52   :  { %575 = vmatpush.bf16.msrb.mxu1 %v1724_v11 }
  0x54   :  { %547 = vmatpush.bf16.msrb.mxu0 %v1696_v8 }
  0x56   :  { %576 = vmatpush.bf16.msrb.mxu1 %v1700_v16 }
  0x58   :  { %548 = vmatpush.bf16.msrb.mxu0 %v1672_v14 }
  0x5a   :  { %443 = vmatmul.bf16.gmra.mxu0 %v1853_v15  ;;  %577 = vmatpush.bf16.msrb.mxu1 %v1676_v19 }
  0x5b   :  { %501 = vmatmul.bf16.gmra.mxu2 %v1853_v15 }
  0x5d   :  { %472 = vmatmul.bf16.gmra.mxu1 %v1853_v15 }
  0x5e   :  { %530 = vmatmul.bf16.gmra.mxu3 %v1853_v15 }
  0x6a   :  { %448 = vmatmul.bf16.gmra.mxu0 %v1854_v20 }
  0x6b   :  { %506 = vmatmul.bf16.gmra.mxu2 %v1854_v20 }
  0x6d   :  { %477 = vmatmul.bf16.gmra.mxu1 %v1854_v20 }
  0x6e   :  { %535 = vmatmul.bf16.gmra.mxu3 %v1854_v20 }
  0x7a   :  { %549 = vmatmul.bf16.vlgmr.msrb.gmra.mxu0 %v2146_v33 }
  0x7d   :  { %578 = vmatmul.bf16.vlgmr.msrb.gmra.mxu1 %v2146_v33 }
  0x8a   :  { %554 = vmatmul.bf16.gmra.mxu0 %v1852_v55 }
  0x8d   :  { %583 = vmatmul.bf16.gmra.mxu1 %v1852_v55 }
  0x9a   :  { %559 = vmatmul.bf16.gmra.mxu0 %v1853_v15 }
  0x9d   :  { %588 = vmatmul.bf16.gmra.mxu1 %v1853_v15 }
  0xaa   :  { %564 = vmatmul.bf16.gmra.mxu0 %v1854_v20 }
  0xad   :  { %593 = vmatmul.bf16.gmra.mxu1 %v1854_v20 }
  0xb7   :  { %v2154_v21 = vpop.f32.mrf.mxu0 }
  0xb8   :  { %2699 = vst [vmem:[#allocation16_spill] sm:$0xff] %v2154_v21 }
  0xba   :  { %v2156_v22 = vpop.f32.mrf.mxu1 }
  0xbe   :  { %v492_v23 = vpop.f32.mrf.mxu2 }
  0xbf   :  { %795 = vrot.lane.b32.xlu0 %v492_v23, %s2053_s13  ;;  %v2159_v24 = vpop.f32.mrf.mxu0  ;;  %v739_v27 = vrot.slane %v492_v23, 1 }
  0xc1   :  { %v2161_v25 = vpop.f32.mrf.mxu3 }
  0xc2   :  { %v2163_v26 = vpop.f32.mrf.mxu1  ;;  %v867_v33 = vrot.slane %v2161_v25, 3 }
  0xc3   :  { %2700 = vst [vmem:[#allocation17_spill] sm:$0xff] %v2163_v26 }
  0xc6   :  { %v494_v28 = vpop.f32.mrf.mxu2 }
  0xc7   :  { %755 = vrot.lane.b32.xlu0 %v739_v27, %s2053_s13  ;;  %v2166_v29 = vpop.f32.mrf.mxu0  ;;  %v740_v30 = vrot.slane %v494_v28, 1 }
  0xc9   :  { %757 = vrot.lane.b32.xlu1 %v740_v30, %s2053_s13  ;;  %v2169_v31 = vpop.f32.mrf.mxu3 }
  0xca   :  { %v2171_v32 = vpop.f32.mrf.mxu1  ;;  %v868_v36 = vrot.slane %v2169_v31, 3 }
  0xce   :  { %v497_v34 = vpop.f32.mrf.mxu2 }
  0xcf   :  { %883 = vrot.lane.b32.xlu0 %v867_v33, %s2053_s13  ;;  %799 = vrot.lane.b32.xlu2 %v497_v34, %s2053_s13  ;;  %v2176_v35 = vpop.f32.mrf.mxu0  ;;  %v741_v40 = vrot.slane %v497_v34, 1 }
  0xd1   :  { %885 = vrot.lane.b32.xlu1 %v868_v36, %s2053_s13  ;;  %v2180_v37 = vpop.f32.mrf.mxu3 }
  0xd2   :  { %v2182_v38 = vpop.f32.mrf.mxu1  ;;  %v869_v39 = vrot.slane %v2180_v37, 3 }
  0xd6   :  { %v499_v41 = vpop.f32.mrf.mxu2 }
  0xd7   :  { %797 = vrot.lane.b32.xlu0 %v494_v28, %s2053_s13  ;;  %887 = vrot.lane.b32.xlu2 %v869_v39, %s2053_s13  ;;  %v2187_v42 = vpop.f32.mrf.mxu0  ;;  %v742_v50 = vrot.slane %v499_v41, 1 }
  0xd9   :  { %759 = vrot.lane.b32.xlu1 %v741_v40, %s2053_s13  ;;  %v2190_v43 = vpop.f32.mrf.mxu3 }
  0xda   :  { %v2192_v44 = vpop.f32.mrf.mxu1  ;;  %v870_v45 = vrot.slane %v2190_v43, 3 }
  0xde   :  { %v502_v46 = vpop.f32.mrf.mxu2 }
  0xdf   :  { %889 = vrot.lane.b32.xlu2 %v870_v45, %s2053_s13  ;;  %801 = vrot.lane.b32.xlu0 %v499_v41, %s2053_s13  ;;  %v2197_v47 = vpop.f32.mrf.mxu0  ;;  %v743_v56 = vrot.slane %v502_v46, 1 }
  0xe1   :  { %v2199_v48 = vpop.f32.mrf.mxu3 }
  0xe2   :  { %v2201_v49 = vpop.f32.mrf.mxu1  ;;  %v871_v60 = vrot.slane %v2199_v48, 3 }
  0xe6   :  { %v504_v51 = vpop.f32.mrf.mxu2 }
  0xe7   :  { %761 = vrot.lane.b32.xlu0 %v742_v50, %s2053_s13  ;;  %803 = vrot.lane.b32.xlu2 %v502_v46, %s2053_s13  ;;  %v2205_v52 = vpop.f32.mrf.mxu0  ;;  %v744_v57 = vrot.slane %v504_v51, 1 }
  0xe8   :  { %805 = vrot.lane.b32.xlu1 %v504_v51, %s2053_s13 }
  0xe9   :  { %v2208_v53 = vpop.f32.mrf.mxu3 }
  0xea   :  { %v2210_v54 = vpop.f32.mrf.mxu1  ;;  %v872_v55 = vrot.slane %v2208_v53, 3 }
  0xee   :  { %v507_v61 = vpop.f32.mrf.mxu2 }
  0xef   :  { %893 = vrot.lane.b32.xlu2 %v872_v55, %s2053_s13  ;;  %763 = vrot.lane.b32.xlu0 %v743_v56, %s2053_s13  ;;  %v2215_v58 = vpop.f32.mrf.mxu0  ;;  %v745_v0 = vrot.slane %v507_v61, 1 }
  0xf0   :  { %765 = vrot.lane.b32.xlu1 %v744_v57, %s2053_s13 }
  0xf1   :  { %v2227_v3 = vpop.f32.mrf.mxu3 }
  0xf2   :  { %v2218_v59 = vpop.f32.mrf.mxu1  ;;  %2701 = vst [vmem:[#allocation18_spill] sm:$0xff] %v2227_v3  ;;  %v873_v4 = vrot.slane %v2227_v3, 3 }
  0xf6   :  { %v509_v2 = vpop.f32.mrf.mxu2 }
  0xf7   :  { %891 = vrot.lane.b32.xlu0 %v871_v60, %s2053_s13  ;;  %807 = vrot.lane.b32.xlu2 %v507_v61, %s2053_s13  ;;  %v550_v62 = vpop.f32.mrf.mxu0  ;;  %v746_v11 = vrot.slane %v509_v2, 1 }
  0xf8   :  { %1045 = vrot.lane.b32.xlu1 %v550_v62, %s2053_s13  ;;  %v989_v5 = vrot.slane %v550_v62, 1 }
  0xf9   :  { %v2239_v13 = vpop.f32.mrf.mxu3 }
  0xfa   :  { %v579_v63 = vpop.f32.mrf.mxu1  ;;  %v874_v15 = vrot.slane %v2239_v13, 3 }
  0xfb   :  { %v1117_v1 = vrot.slane %v579_v63, 3 }
  0xff   :  { %767 = vrot.lane.b32.xlu0 %v745_v0, %s2053_s13  ;;  %809 = vrot.lane.b32.xlu2 %v509_v2, %s2053_s13  ;;  %v552_v7 = vpop.f32.mrf.mxu0 }
 0x100   :  { %1133 = vrot.lane.b32.xlu1 %v1117_v1, %s2053_s13  ;;  %v990_v19 = vrot.slane %v552_v7, 1 }
 0x102   :  { %v581_v6 = vpop.f32.mrf.mxu1 }
 0x103   :  { %v1118_v8 = vrot.slane %v581_v6, 3 }
 0x107   :  { %895 = vrot.lane.b32.xlu0 %v873_v4, %s2053_s13  ;;  %1005 = vrot.lane.b32.xlu2 %v989_v5, %s2053_s13  ;;  %v555_v10 = vpop.f32.mrf.mxu0 }
 0x108   :  { %1047 = vrot.lane.b32.xlu1 %v552_v7, %s2053_s13  ;;  %v991_v14 = vrot.slane %v555_v10, 1 }
 0x10a   :  { %v584_v9 = vpop.f32.mrf.mxu1 }
 0x10b   :  { %v1119_v18 = vrot.slane %v584_v9, 3 }
 0x10f   :  { %1173 = vrot.lane.b32.xlu0 %v579_v63, %s2053_s13  ;;  %1135 = vrot.lane.b32.xlu2 %v1118_v8, %s2053_s13  ;;  %v557_v16 = vpop.f32.mrf.mxu0 }
 0x110   :  { %1175 = vrot.lane.b32.xlu1 %v581_v6, %s2053_s13  ;;  %v992_v30 = vrot.slane %v557_v16, 1 }
 0x112   :  { %v586_v12 = vpop.f32.mrf.mxu1 }
 0x113   :  { %v1120_v28 = vrot.slane %v586_v12, 3 }
 0x117   :  { %769 = vrot.lane.b32.xlu0 %v746_v11, %s2053_s13  ;;  %1049 = vrot.lane.b32.xlu2 %v555_v10, %s2053_s13  ;;  %v560_v36 = vpop.f32.mrf.mxu0 }
 0x118   :  { %1177 = vrot.lane.b32.xlu1 %v584_v9, %s2053_s13  ;;  %v993_v50 = vrot.slane %v560_v36, 1 }
 0x11a   :  { %v589_v17 = vpop.f32.mrf.mxu1 }
 0x11b   :  { %v1121_v61 = vrot.slane %v589_v17, 3 }
 0x11f   :  { %897 = vrot.lane.b32.xlu0 %v874_v15, %s2053_s13  ;;  %1009 = vrot.lane.b32.xlu2 %v991_v14, %s2053_s13  ;;  %v562_v45 = vpop.f32.mrf.mxu0 }
 0x120   :  { %1051 = vrot.lane.b32.xlu1 %v557_v16, %s2053_s13  ;;  %v994_v8 = vrot.slane %v562_v45, 1 }
 0x122   :  { %v591_v23 = vpop.f32.mrf.mxu1 }
 0x123   :  { %v1122_v27 = vrot.slane %v591_v23, 3 }
 0x127   :  { %1007 = vrot.lane.b32.xlu0 %v990_v19, %s2053_s13  ;;  %1137 = vrot.lane.b32.xlu2 %v1119_v18, %s2053_s13  ;;  %v565_v62 = vpop.f32.mrf.mxu0 }
 0x128   :  { %1179 = vrot.lane.b32.xlu1 %v586_v12, %s2053_s13  ;;  %v995_v2 = vrot.slane %v565_v62, 1 }
 0x129   :  { %v800_v20 = vpop.permute.xlu2 %799 }
 0x12a   :  { %v594_v39 = vpop.f32.mrf.mxu1  ;;  %v821_v9 = vrot.slane %v800_v20, 2 }
 0x12b   :  { %v1123_v46 = vrot.slane %v594_v39, 3 }
 0x12f   :  { %1139 = vrot.lane.b32.xlu2 %v1120_v28, %s2053_s13  ;;  %1011 = vrot.lane.b32.xlu0 %v992_v30, %s2053_s13  ;;  %v567_v10 = vpop.f32.mrf.mxu0 }
 0x130   :  { %1143 = vrot.lane.b32.xlu1 %v1122_v27, %s2053_s13  ;;  %v996_v15 = vrot.slane %v567_v10, 1 }
 0x131   :  { %v796_v33 = vpop.permute.xlu0 %795  ;;  %v2251_v34 = vpop.permute.xlu2 %887 }
 0x132   :  { %v596_v55 = vpop.f32.mrf.mxu1  ;;  %v819_v4 = vrot.slane %v796_v33, 2 }
 0x133   :  { %v1124_v60 = vrot.slane %v596_v55, 3 }
 0x137   :  { %1181 = vrot.lane.b32.xlu2 %v589_v17, %s2053_s13  ;;  %1053 = vrot.lane.b32.xlu0 %v560_v36, %s2053_s13 }
 0x138   :  { %1185 = vrot.lane.b32.xlu1 %v594_v39, %s2053_s13 }
 0x139   :  { %v2256_v40 = vpop.permute.xlu0 %755  ;;  %v2258_v41 = vpop.permute.xlu2 %889 }
 0x13b   :  { %v2260_v51 = vpop.permute.xlu1 %757 }
 0x13f   :  { %1183 = vrot.lane.b32.xlu0 %v591_v23, %s2053_s13  ;;  %1013 = vrot.lane.b32.xlu2 %v993_v50, %s2053_s13 }
 0x140   :  { %1145 = vrot.lane.b32.xlu1 %v1123_v46, %s2053_s13 }
 0x141   :  { %v2265_v56 = vpop.permute.xlu0 %883  ;;  %v804_v57 = vpop.permute.xlu2 %803 }
 0x142   :  { %v823_v16 = vrot.slane %v804_v57, 2 }
 0x143   :  { %v2269_v63 = vpop.permute.xlu1 %885 }
 0x147   :  { %1141 = vrot.lane.b32.xlu2 %v1121_v61, %s2053_s13  ;;  %1057 = vrot.lane.b32.xlu0 %v565_v62, %s2053_s13 }
 0x148   :  { %1147 = vrot.lane.b32.xlu1 %v1124_v60, %s2053_s13 }
 0x149   :  { %v798_v0 = vpop.permute.xlu0 %797  ;;  %v2272_v1 = vpop.permute.xlu2 %893 }
 0x14a   :  { %v820_v20 = vrot.slane %v798_v0, 2 }
 0x14b   :  { %v2277_v7 = vpop.permute.xlu1 %759 }
 0x14f   :  { %1055 = vrot.lane.b32.xlu2 %v562_v45, %s2053_s13  ;;  %1017 = vrot.lane.b32.xlu0 %v995_v2, %s2053_s13 }
 0x150   :  { %835 = vrot.lane.b32.xlu1 %v819_v4, %s2053_s13 }
 0x151   :  { %v802_v5 = vpop.permute.xlu0 %801  ;;  %v808_v6 = vpop.permute.xlu2 %807 }
 0x152   :  { %v822_v33 = vrot.slane %v802_v5, 2 }
 0x157   :  { %1015 = vrot.lane.b32.xlu2 %v994_v8, %s2053_s13  ;;  %1059 = vrot.lane.b32.xlu0 %v567_v10, %s2053_s13 }
 0x158   :  { %839 = vrot.lane.b32.xlu1 %v821_v9, %s2053_s13 }
 0x159   :  { %v2282_v11 = vpop.permute.xlu0 %761  ;;  %v810_v12 = vpop.permute.xlu2 %809 }
 0x15a   :  { %v806_v14 = vpop.permute.xlu1 %805  ;;  %v826_v36 = vrot.slane %v810_v12, 2 }
 0x15b   :  { %v824_v23 = vrot.slane %v806_v14, 2 }
 0x15f   :  { %1187 = vrot.lane.b32.xlu2 %v596_v55, %s2053_s13  ;;  %1019 = vrot.lane.b32.xlu0 %v996_v15, %s2053_s13  ;;  %v825_v55 = vrot.slane %v808_v6, 2 }
 0x160   :  { %843 = vrot.lane.b32.xlu1 %v823_v16, %s2053_s13 }
 0x161   :  { %v2287_v17 = vpop.permute.xlu0 %763  ;;  %v2289_v18 = vpop.permute.xlu2 %1005 }
 0x162   :  { %v2291_v19 = vpop.permute.xlu1 %765 }
 0x167   :  { %837 = vrot.lane.b32.xlu2 %v820_v20, %s2053_s13 }
 0x168   :  { %845 = vrot.lane.b32.xlu1 %v824_v23, %s2053_s13 }
 0x169   :  { %v2295_v27 = vpop.permute.xlu0 %891  ;;  %v2297_v28 = vpop.permute.xlu2 %1135 }
 0x16a   :  { %v1046_v30 = vpop.permute.xlu1 %1045 }
 0x16b   :  { %v1069_v50 = vrot.slane %v1046_v30, 2 }
 0x16f   :  { %841 = vrot.lane.b32.xlu2 %v822_v33, %s2053_s13 }
 0x170   :  { %849 = vrot.lane.b32.xlu1 %v826_v36, %s2053_s13 }
 0x171   :  { %v2301_v39 = vpop.permute.xlu0 %767  ;;  %v1050_v45 = vpop.permute.xlu2 %1049 }
 0x172   :  { %v2303_v46 = vpop.permute.xlu1 %1133  ;;  %v1071_v10 = vrot.slane %v1050_v45, 2 }
 0x177   :  { %847 = vrot.lane.b32.xlu2 %v825_v55, %s2053_s13 }
 0x178   :  { %1085 = vrot.lane.b32.xlu1 %v1069_v50, %s2053_s13 }
 0x179   :  { %v2307_v57 = vpop.permute.xlu0 %895  ;;  %v2309_v60 = vpop.permute.xlu2 %1009 }
 0x17a   :  { %v1048_v61 = vpop.permute.xlu1 %1047 }
 0x17b   :  { %v1070_v62 = vrot.slane %v1048_v61, 2 }
 0x17f   :  { %1087 = vrot.lane.b32.xlu2 %v1070_v62, %s2053_s13 }
 0x181   :  { %v1174_v0 = vpop.permute.xlu0 %1173  ;;  %v2312_v2 = vpop.permute.xlu2 %1137 }
 0x182   :  { %v1197_v4 = vrot.slane %v1174_v0, 4  ;;  %v1176_v5 = vpop.permute.xlu1 %1175 }
 0x183   :  { %v1198_v8 = vrot.slane %v1176_v5, 4 }
 0x184   :  { %1213 = vrot.lane.b32.xlu0 %v1197_v4, %s2053_s13 }
 0x185   :  { %1215 = vrot.lane.b32.xlu1 %v1198_v8, %s2053_s13 }
 0x189   :  { %v2316_v6 = vpop.permute.xlu0 %769  ;;  %v2318_v9 = vpop.permute.xlu2 %1139 }
 0x18a   :  { %v1178_v12 = vpop.permute.xlu1 %1177 }
 0x18b   :  { %v1199_v14 = vrot.slane %v1178_v12, 4 }
 0x18c   :  { %1089 = vrot.lane.b32.xlu0 %v1071_v10, %s2053_s13 }
 0x191   :  { %v2321_v15 = vpop.permute.xlu0 %897  ;;  %v1182_v16 = vpop.permute.xlu2 %1181 }
 0x192   :  { %v1052_v20 = vpop.permute.xlu1 %1051  ;;  %v1201_v62 = vrot.slane %v1182_v16, 4 }
 0x193   :  { %v1072_v33 = vrot.slane %v1052_v20, 2 }
 0x194   :  { %1217 = vrot.lane.b32.xlu0 %v1199_v14, %s2053_s13 }
 0x199   :  { %v2324_v23 = vpop.permute.xlu0 %1007  ;;  %v2326_v30 = vpop.permute.xlu2 %1013 }
 0x19a   :  { %v1180_v36 = vpop.permute.xlu1 %1179 }
 0x19b   :  { %v1200_v50 = vrot.slane %v1180_v36, 4 }
 0x19c   :  { %1091 = vrot.lane.b32.xlu0 %v1072_v33, %s2053_s13 }
 0x19d   :  { %1219 = vrot.lane.b32.xlu2 %v1200_v50, %s2053_s13 }
 0x1a1   :  { %v2330_v45 = vpop.permute.xlu0 %1011  ;;  %v2332_v55 = vpop.permute.xlu2 %1141 }
 0x1a2   :  { %v2334_v61 = vpop.permute.xlu1 %1143 }
 0x1a5   :  { %1221 = vrot.lane.b32.xlu2 %v1201_v62, %s2053_s13 }
 0x1a9   :  { %v1054_v0 = vpop.permute.xlu0 %1053  ;;  %v1056_v4 = vpop.permute.xlu2 %1055 }
 0x1aa   :  { %v1073_v5 = vrot.slane %v1054_v0, 2  ;;  %v2337_v8 = vpop.permute.xlu1 %1185  ;;  %v1074_v14 = vrot.slane %v1056_v4, 2  ;;  %v599_v0 = vlaneseq  ;;  %v780_v4 = vadd.f32 %v2260_v51, %v2163_v26 }
 0x1ac   :  { %1093 = vrot.lane.b32.xlu1 %v1073_v5, %s2053_s13  ;;  %v779_v5 = vadd.f32 %v2256_v40, %v2156_v22 }
 0x1b1   :  { %v1184_v10 = vpop.permute.xlu0 %1183  ;;  %v2340_v12 = vpop.permute.xlu2 %1015 }
 0x1b2   :  { %v1202_v20 = vrot.slane %v1184_v10, 4  ;;  %v2342_v33 = vpop.permute.xlu1 %1145  ;;  %v2355_v10 = vshrl.u32 %v599_v0, 7 }
 0x1b3   :  { %2702 = vst [vmem:[#allocation19_spill] sm:$0xff] %v2342_v33 }
 0x1b4   :  { %1095 = vrot.lane.b32.xlu1 %v1074_v14, %s2053_s13  ;;  %1223 = vrot.lane.b32.xlu2 %v1202_v20, %s2053_s13  ;;  %vm923_vm0 = vcmp.le.s32.totalorder %v2355_v10, 4  ;;  %vm1253_vm9 = vcmp.le.s32.totalorder %v2355_v10, 3  ;;  %vm673_vm10 = vcmp.le.s32.totalorder %v2355_v10, 5  ;;  %v1334_v10 = vld [vmem:[%s2687_s4 + $0x80] sm:$0xff] }
 0x1b9   :  { %v1188_v16 = vpop.permute.xlu2 %1187  ;;  %v1058_v36 = vpop.permute.xlu0 %1057 }
 0x1ba   :  { %v1075_v50 = vrot.slane %v1058_v36, 2  ;;  %v2346_v62 = vpop.permute.xlu1 %1147  ;;  %v1204_v36 = vrot.slane %v1188_v16, 4  ;;  %v782_v16 = vadd.f32 %v2282_v11, %v2182_v38 }
 0x1bb   :  { %2703 = vst [vmem:[#allocation20_spill] sm:$0xff] %v2346_v62 }
 0x1bc   :  { %609 = vrot.lane.b32.xlu2 %v2154_v21, %s2053_s13  ;;  %1097 = vrot.lane.b32.xlu1 %v1075_v50, %s2053_s13 }
 0x1c1   :  { %v838_v14 = vpop.permute.xlu2 %837  ;;  %v2357_v20 = vpop.permute.xlu0 %1017 }
 0x1c2   :  { %v860_v33 = vadd.f32 %v838_v14, %v780_v4  ;;  %v836_v62 = vpop.permute.xlu1 %835 }
 0x1c3   :  { %v859_v3 = vadd.f32 %v836_v62, %v779_v5 }
 0x1c4   :  { %v908_v21 = vadd.f32 %v2269_v63, %v860_v33  ;;  %615 = vrot.lane.b32.xlu2 %v2176_v35, %s2053_s13  ;;  %1227 = vrot.lane.b32.xlu1 %v1204_v36, %s2053_s13  ;;  %v781_v63 = vadd.f32 %v2277_v7, %v2171_v32 }
 0x1c5   :  { %v907_v40 = vadd.f32 %v2265_v56, %v859_v3 }
 0x1c6   :  { %v916_v51 = vmax.f32 %v908_v21, 0.0 }
 0x1c7   :  { %v915_v50 = vmax.f32 %v907_v40, 0.0 }
 0x1c8   :  { %v925_v62 = vsel %vm923_vm0, %v916_v51, 0.0 }
 0x1c9   :  { %v940_v33 = vsel %vm932_vm1, %v925_v62, -inf  ;;  %v924_v0 = vsel %vm923_vm0, %v915_v50, 0.0  ;;  %v842_v4 = vpop.permute.xlu2 %841  ;;  %v1060_v5 = vpop.permute.xlu0 %1059 }
 0x1ca   :  { %v941_v3 = vrot.slane %v940_v33, 4  ;;  %v933_v21 = vsel %vm932_vm1, %v924_v0, -inf  ;;  %v862_v56 = vadd.f32 %v842_v4, %v782_v16  ;;  %v1076_v14 = vrot.slane %v1060_v5, 2  ;;  %v840_v36 = vpop.permute.xlu1 %839 }
 0x1cb   :  { %v934_v11 = vrot.slane %v933_v21, 4  ;;  %v861_v40 = vadd.f32 %v840_v36, %v781_v63  ;;  %v783_v63 = vadd.f32 %v2287_v17, %v2192_v44 }
 0x1cc   :  { %v942_v26 = vmax.f32 %v940_v33, %v941_v3  ;;  %v910_v51 = vadd.f32 %v2258_v41, %v862_v56  ;;  %621 = vrot.lane.b32.xlu2 %v2205_v52, %s2053_s13  ;;  %613 = vrot.lane.b32.xlu1 %v2166_v29, %s2053_s13  ;;  %v785_v41 = vadd.f32 %v2301_v39, %v2210_v54  ;;  %v1203_v3 = vrot.slane %v2337_v8, 4 }
 0x1cd   :  { %v935_v7 = vmax.f32 %v933_v21, %v934_v11  ;;  %v909_v50 = vadd.f32 %v2251_v34, %v861_v40  ;;  %1099 = vrot.lane.b32.xlu0 %v1076_v14, %s2053_s13 }
 0x1ce   :  { %v943_v62 = vrot.slane %v942_v26, 2  ;;  %v918_v16 = vmax.f32 %v910_v51, 0.0 }
 0x1cf   :  { %v936_v0 = vrot.slane %v935_v7, 2  ;;  %v917_v4 = vmax.f32 %v909_v50, 0.0 }
 0x1d0   :  { %v944_v33 = vmax.f32 %v942_v26, %v943_v62  ;;  %v927_v5 = vsel %vm923_vm0, %v918_v16, 0.0 }
 0x1d1   :  { %v937_v21 = vmax.f32 %v935_v7, %v936_v0  ;;  %v954_v34 = vsel %vm932_vm1, %v927_v5, -inf  ;;  %v926_v56 = vsel %vm923_vm0, %v917_v4, 0.0  ;;  %v848_v14 = vpop.permute.xlu2 %847 }
 0x1d2   :  { %v945_v36 = vrot.slane %v944_v33, 1  ;;  %v955_v11 = vrot.slane %v954_v34, 4  ;;  %v947_v17 = vsel %vm932_vm1, %v926_v56, -inf  ;;  %v865_v40 = vadd.f32 %v848_v14, %v785_v41  ;;  %v844_v51 = vpop.permute.xlu1 %843 }
 0x1d3   :  { %v938_v39 = vrot.slane %v937_v21, 1  ;;  %v948_v26 = vrot.slane %v947_v17, 4  ;;  %v863_v50 = vadd.f32 %v844_v51, %v783_v63 }
 0x1d4   :  { %v956_v62 = vmax.f32 %v954_v34, %v955_v11  ;;  %v913_v16 = vadd.f32 %v2307_v57, %v865_v40  ;;  %619 = vrot.lane.b32.xlu1 %v2197_v47, %s2053_s13  ;;  %v946_v8 = vmax.f32 %v944_v33, %v945_v36  ;;  %v784_v11 = vadd.f32 %v2291_v19, %v2201_v49 }
 0x1d5   :  { %v939_v7 = vmax.f32 %v937_v21, %v938_v39  ;;  %v949_v0 = vmax.f32 %v947_v17, %v948_v26  ;;  %v911_v4 = vadd.f32 %v2295_v27, %v863_v50  ;;  %1225 = vrot.lane.b32.xlu0 %v1203_v3, %s2053_s13 }
 0x1d6   :  { %v957_v5 = vrot.slane %v956_v62, 2  ;;  %v921_v41 = vmax.f32 %v913_v16, 0.0 }
 0x1d7   :  { %v950_v56 = vrot.slane %v949_v0, 2  ;;  %v919_v14 = vmax.f32 %v911_v4, 0.0  ;;  %v1431_v63 = vsel %vm1367_vm2, %v946_v8, %v939_v7 }
 0x1d8   :  { %v958_v34 = vmax.f32 %v956_v62, %v957_v5  ;;  %v930_v57 = vsel %vm923_vm0, %v921_v41, 0.0  ;;  %v786_v41 = vadd.f32 %v2316_v6, %v2218_v59 }
 0x1d9   :  { %v951_v33 = vmax.f32 %v949_v0, %v950_v56  ;;  %v975_v21 = vsel %vm932_vm1, %v930_v57, -inf  ;;  %v928_v27 = vsel %vm923_vm0, %v919_v14, 0.0 }
 0x1da   :  { %v959_v3 = vrot.slane %v958_v34, 1  ;;  %v976_v36 = vrot.slane %v975_v21, 4  ;;  %v961_v17 = vsel %vm932_vm1, %v928_v27, -inf  ;;  %v846_v40 = vpop.permute.xlu1 %845 }
 0x1db   :  { %v952_v51 = vrot.slane %v951_v33, 1  ;;  %v962_v39 = vrot.slane %v961_v17, 4  ;;  %v864_v26 = vadd.f32 %v846_v40, %v784_v11 }
 0x1dc   :  { %v960_v19 = vmax.f32 %v958_v34, %v959_v3  ;;  %v977_v8 = vmax.f32 %v975_v21, %v976_v36 }
 0x1dd   :  { %v953_v50 = vmax.f32 %v951_v33, %v952_v51  ;;  %v963_v62 = vmax.f32 %v961_v17, %v962_v39  ;;  %v912_v16 = vadd.f32 %v2272_v1, %v864_v26  ;;  %611 = vrot.lane.b32.xlu0 %v2159_v24, %s2053_s13 }
 0x1de   :  { %v978_v1 = vrot.slane %v977_v8, 2 }
 0x1df   :  { %v964_v7 = vrot.slane %v963_v62, 2  ;;  %v920_v0 = vmax.f32 %v912_v16, 0.0  ;;  %v1432_v4 = vsel %vm1369_vm3, %v953_v50, %v1431_v63 }
 0x1e0   :  { %v1433_v5 = vsel %vm1371_vm4, %v960_v19, %v1432_v4  ;;  %v979_v6 = vmax.f32 %v977_v8, %v978_v1  ;;  %v2426_v8 = vpop.permute.xlu0 %1019  ;;  %v1029_v4 = vadd.f32 %v2289_v18, %v2161_v25 }
 0x1e1   :  { %v965_v56 = vmax.f32 %v963_v62, %v964_v7  ;;  %v929_v14 = vsel %vm923_vm0, %v920_v0, 0.0 }
 0x1e2   :  { %v968_v57 = vsel %vm932_vm1, %v929_v14, -inf  ;;  %v850_v11 = vpop.permute.xlu1 %849  ;;  %v980_v50 = vrot.slane %v979_v6, 1  ;;  %v1030_v14 = vadd.f32 %v2324_v23, %v2169_v31 }
 0x1e3   :  { %v966_v33 = vrot.slane %v965_v56, 1  ;;  %v969_v34 = vrot.slane %v968_v57, 4  ;;  %v866_v21 = vadd.f32 %v850_v11, %v786_v41 }
 0x1e4   :  { %v981_v0 = vmax.f32 %v979_v6, %v980_v50  ;;  %v1031_v50 = vadd.f32 %v2309_v60, %v2180_v37 }
 0x1e5   :  { %v967_v27 = vmax.f32 %v965_v56, %v966_v33  ;;  %v970_v3 = vmax.f32 %v968_v57, %v969_v34  ;;  %v914_v63 = vadd.f32 %v2321_v15, %v866_v21  ;;  %617 = vrot.lane.b32.xlu0 %v2187_v42, %s2053_s13 }
 0x1e7   :  { %v971_v36 = vrot.slane %v970_v3, 2  ;;  %v922_v17 = vmax.f32 %v914_v63, 0.0  ;;  %v1434_v40 = vsel %vm1373_vm5, %v967_v27, %v1433_v5  ;;  %v1088_v5 = vpop.permute.xlu2 %1087 }
 0x1e8   :  { %v1110_v33 = vadd.f32 %v1088_v5, %v1030_v14 }
 0x1e9   :  { %v972_v51 = vmax.f32 %v970_v3, %v971_v36  ;;  %v931_v39 = vsel %vm923_vm0, %v922_v17, 0.0  ;;  %vm1616_vm0 = vcmask 57344  }
 0x1ea   :  { %v982_v26 = vsel %vm932_vm1, %v931_v39, -inf  ;;  %v1086_v7 = vpop.permute.xlu1 %1085  ;;  %v1158_v25 = vadd.f32 %v2297_v28, %v1110_v33 }
 0x1eb   :  { %v973_v62 = vrot.slane %v972_v51, 1  ;;  %v983_v16 = vrot.slane %v982_v26, 4  ;;  %v1109_v57 = vadd.f32 %v1086_v7, %v1029_v4 }
 0x1ed   :  { %v984_v19 = vmax.f32 %v982_v26, %v983_v16  ;;  %623 = vrot.lane.b32.xlu0 %v2215_v58, %s2053_s13  ;;  %v974_v15 = vmax.f32 %v972_v51, %v973_v62  ;;  %v1157_v21 = vadd.f32 %v2303_v46, %v1109_v57 }
 0x1ef   :  { %v985_v41 = vrot.slane %v984_v19, 2  ;;  %v1435_v56 = vsel %vm1375_vm6, %v974_v15, %v1434_v40 }
 0x1f0   :  { %v1436_v1 = vsel %vm1377_vm7, %v981_v0, %v1435_v56 }
 0x1f1   :  { %v986_v11 = vmax.f32 %v984_v19, %v985_v41 }
 0x1f3   :  { %v987_v34 = vrot.slane %v986_v11, 1 }
 0x1f5   :  { %v988_v27 = vmax.f32 %v986_v11, %v987_v34 }
 0x1f6   :  { %v1214_v3 = vpop.permute.xlu0 %1213 }
 0x1f7   :  { %v1237_v18 = vadd.f32 %v1214_v3, %v1157_v21  ;;  %v1216_v63 = vpop.permute.xlu1 %1215  ;;  %v1437_v6 = vsel %vm1379_vm8, %v988_v27, %v1436_v1  ;;  %v1032_v21 = vadd.f32 %v2330_v45, %v2190_v43 }
 0x1f8   :  { %v1238_v31 = vadd.f32 %v1216_v63, %v1158_v25  ;;  %1438 = vrot.lane.b32.xlu1 %v1437_v6, %s2053_s13  ;;  %v1220_v6 = vpop.permute.xlu2 %1219 }
 0x1f9   :  { %v1245_v23 = vmax.f32 %v1237_v18, 0.0 }
 0x1fa   :  { %v1246_v36 = vmax.f32 %v1238_v31, 0.0 }
 0x1fb   :  { %v1254_v17 = vsel %vm1253_vm9, %v1245_v23, 0.0 }
 0x1fc   :  { %v1262_v46 = vsel %vm932_vm1, %v1254_v17, -inf  ;;  %v1255_v40 = vsel %vm1253_vm9, %v1246_v36, 0.0 }
 0x1fd   :  { %v1263_v28 = vrot.slane %v1262_v46, 4  ;;  %v1269_v51 = vsel %vm932_vm1, %v1255_v40, -inf }
 0x1fe   :  { %v1270_v39 = vrot.slane %v1269_v51, 4  ;;  %v1090_v26 = vpop.permute.xlu0 %1089 }
 0x1ff   :  { %v1264_v62 = vmax.f32 %v1262_v46, %v1263_v28  ;;  %v1111_v15 = vadd.f32 %v1090_v26, %v1031_v50 }
 0x200   :  { %v1271_v16 = vmax.f32 %v1269_v51, %v1270_v39  ;;  %v1033_v39 = vadd.f32 %v2326_v30, %v2199_v48  ;;  %v1222_v50 = vpop.permute.xlu2 %1221 }
 0x201   :  { %v1265_v19 = vrot.slane %v1264_v62, 2  ;;  %v1159_v41 = vadd.f32 %v2312_v2, %v1111_v15 }
 0x202   :  { %v1272_v7 = vrot.slane %v1271_v16, 2 }
 0x203   :  { %v1266_v0 = vmax.f32 %v1264_v62, %v1265_v19 }
 0x204   :  { %v1273_v4 = vmax.f32 %v1271_v16, %v1272_v7 }
 0x205   :  { %v1267_v5 = vrot.slane %v1266_v0, 1 }
 0x206   :  { %v1274_v56 = vrot.slane %v1273_v4, 1  ;;  %v1218_v14 = vpop.permute.xlu0 %1217 }
 0x207   :  { %v1239_v1 = vadd.f32 %v1218_v14, %v1159_v41  ;;  %v1268_v57 = vmax.f32 %v1266_v0, %v1267_v5 }
 0x208   :  { %v1275_v11 = vmax.f32 %v1273_v4, %v1274_v56  ;;  %v1034_v4 = vadd.f32 %v2340_v12, %v2208_v53 }
 0x209   :  { %v1247_v33 = vmax.f32 %v1239_v1, 0.0 }
 0x20a   :  { %v1471_v34 = vsel %vm1367_vm2, %v1275_v11, %v1268_v57 }
 0x20b   :  { %v1256_v37 = vsel %vm1253_vm9, %v1247_v33, 0.0 }
 0x20c   :  { %v1276_v60 = vsel %vm932_vm1, %v1256_v37, -inf }
 0x20d   :  { %v1277_v27 = vrot.slane %v1276_v60, 4 }
 0x20e   :  { %v1092_v3 = vpop.permute.xlu0 %1091  ;;  %v1224_v14 = vpop.permute.xlu2 %1223 }
 0x20f   :  { %v1278_v25 = vmax.f32 %v1276_v60, %v1277_v27  ;;  %v1112_v2 = vadd.f32 %v1092_v3, %v1032_v21 }
 0x211   :  { %v1279_v18 = vrot.slane %v1278_v25, 2  ;;  %v1160_v63 = vadd.f32 %v2318_v9, %v1112_v2 }
 0x213   :  { %v1280_v31 = vmax.f32 %v1278_v25, %v1279_v18  ;;  %v1240_v23 = vadd.f32 %v1220_v6, %v1160_v63 }
 0x215   :  { %v1281_v36 = vrot.slane %v1280_v31, 1  ;;  %v1248_v17 = vmax.f32 %v1240_v23, 0.0  ;;  %v1358_v23 = vld [vmem:[#allocation9 + $0x78] sm:$0xff] }
 0x216   :  { %v610_v27 = vpop.permute.xlu2 %609  ;;  %1403 = vmatpush.msrb.mxu3 %v1358_v23 }
 0x217   :  { %v1282_v46 = vmax.f32 %v1280_v31, %v1281_v36  ;;  %v1257_v40 = vsel %vm1253_vm9, %v1248_v17, 0.0  ;;  %v1357_v36 = vld [vmem:[#allocation9 + $0x70] sm:$0xff] }
 0x218   :  { %v1283_v28 = vsel %vm932_vm1, %v1257_v40, -inf  ;;  %1404 = vmatpush.msrb.mxu3 %v1357_v36 }
 0x219   :  { %v1284_v51 = vrot.slane %v1283_v28, 4  ;;  %v1472_v43 = vsel %vm1369_vm3, %v1282_v46, %v1471_v34  ;;  %v633_v46 = vrot.slane %v610_v27, 1 }
 0x21b   :  { %v1285_v45 = vmax.f32 %v1283_v28, %v1284_v51  ;;  %v1356_v28 = vld [vmem:[#allocation9 + $0x68] sm:$0xff] }
 0x21c   :  { %1405 = vmatpush.msrb.mxu3 %v1356_v28 }
 0x21d   :  { %v1286_v26 = vrot.slane %v1285_v45, 2 }
 0x21e   :  { %v1094_v9 = vpop.permute.xlu1 %1093  ;;  %v616_v40 = vpop.permute.xlu2 %615 }
 0x21f   :  { %v1287_v62 = vmax.f32 %v1285_v45, %v1286_v26  ;;  %v1113_v16 = vadd.f32 %v1094_v9, %v1033_v39  ;;  %v1355_v45 = vld [vmem:[#allocation9 + $0x60] sm:$0xff]  ;;  %v1036_v39 = vadd.f32 %v2426_v8, %v2239_v13  ;;  %v1353_v13 = vld [vmem:[#allocation9 + $0x50] sm:$0xff] }
 0x220   :  { %1406 = vmatpush.msrb.mxu3 %v1355_v45  ;;  %v2704_v9 = vld [vmem:[#allocation16_spill] sm:$0xff]  ;;  %v654_v45 = vrot.slane %v2201_v49, 2 }
 0x221   :  { %v1288_v19 = vrot.slane %v1287_v62, 1  ;;  %v1161_v15 = vadd.f32 %v2332_v55, %v1113_v16 }
 0x223   :  { %v1289_v7 = vmax.f32 %v1287_v62, %v1288_v19  ;;  %v1241_v0 = vadd.f32 %v1222_v50, %v1161_v15  ;;  %v641_v50 = vadd.f32 %v633_v46, %v2704_v9  ;;  %v1354_v19 = vld [vmem:[#allocation9 + $0x58] sm:$0xff]  ;;  %v1320_v46 = vld [vmem:[%s2687_s4 + $0x10] sm:$0xff] }
 0x224   :  { %v2705_v15 = vld [vmem:[#allocation18_spill] sm:$0xff]  ;;  %1407 = vmatpush.msrb.mxu3 %v1354_v19  ;;  %v1319_v9 = vld [vmem:[%s2687_s4 + $0x8] sm:$0xff] }
 0x225   :  { %v1249_v5 = vmax.f32 %v1241_v0, 0.0  ;;  %v1473_v41 = vsel %vm1371_vm4, %v1289_v7, %v1472_v43  ;;  %v1035_v7 = vadd.f32 %v2357_v20, %v2705_v15  ;;  %v1347_v19 = vld [vmem:[#allocation9 + $0x20] sm:$0xff] }
 0x226   :  { %v1096_v56 = vpop.permute.xlu1 %1095  ;;  %1408 = vmatpush.msrb.mxu3 %v1353_v13  ;;  %v1345_v13 = vld [vmem:[#allocation9 + $0x10] sm:$0xff] }
 0x227   :  { %v1258_v48 = vsel %vm1253_vm9, %v1249_v5, 0.0  ;;  %v1114_v30 = vadd.f32 %v1096_v56, %v1034_v4  ;;  %v1325_v4 = vld [vmem:[%s2687_s4 + $0x38] sm:$0xff]  ;;  %v649_v5 = vrot.slane %v2156_v22, 2  ;;  %v2706_v56 = vld [vmem:[#allocation20_spill] sm:$0xff] }
 0x228   :  { %v1290_v1 = vsel %vm932_vm1, %v1258_v48, -inf  ;;  %1391 = vmatpush.msrb.mxu2 %v1325_v4  ;;  %v1324_v48 = vld [vmem:[%s2687_s4 + $0x30] sm:$0xff]  ;;  %v1323_v22 = vld [vmem:[%s2687_s4 + $0x28] sm:$0xff] }
 0x229   :  { %v1291_v57 = vrot.slane %v1290_v1, 4  ;;  %v1162_v11 = vadd.f32 %v2334_v61, %v1114_v30  ;;  %v657_v20 = vadd.f32 %v649_v5, %v641_v50  ;;  %v655_v50 = vrot.slane %v2210_v54, 2  ;;  %v1346_v4 = vld [vmem:[#allocation9 + $0x18] sm:$0xff]  ;;  %v1333_v54 = vld [vmem:[%s2687_s4 + $0x78] sm:$0xff] }
 0x22a   :  { %1392 = vmatpush.msrb.mxu2 %v1324_v48 }
 0x22b   :  { %v1292_v55 = vmax.f32 %v1290_v1, %v1291_v57  ;;  %v1242_v33 = vadd.f32 %v1224_v14, %v1162_v11  ;;  %v1352_v1 = vld [vmem:[#allocation9 + $0x48] sm:$0xff]  ;;  %v651_v11 = vrot.slane %v2171_v32, 2  ;;  %v665_v27 = vmax.f32 %v657_v20, 0.0 }
 0x22c   :  { %1409 = vmatpush.msrb.mxu3 %v1352_v1  ;;  %1393 = vmatpush.msrb.mxu2 %v1323_v22  ;;  %v2708_v20 = vld [vmem:[#allocation17_spill] sm:$0xff] }
 0x22d   :  { %v1293_v34 = vrot.slane %v1292_v55, 2  ;;  %v1250_v37 = vmax.f32 %v1242_v33, 0.0  ;;  %v622_v33 = vpop.permute.xlu2 %621 }
 0x22e   :  { %v1098_v60 = vpop.permute.xlu1 %1097 }
 0x22f   :  { %v1294_v53 = vmax.f32 %v1292_v55, %v1293_v34  ;;  %v1259_v12 = vsel %vm1253_vm9, %v1250_v37, 0.0  ;;  %v1115_v8 = vadd.f32 %v1098_v60, %v1035_v7  ;;  %v1351_v34 = vld [vmem:[#allocation9 + $0x40] sm:$0xff] }
 0x230   :  { %v1297_v21 = vsel %vm932_vm1, %v1259_v12, -inf  ;;  %1410 = vmatpush.msrb.mxu3 %v1351_v34 }
 0x231   :  { %v1295_v3 = vrot.slane %v1294_v53, 1  ;;  %v1298_v25 = vrot.slane %v1297_v21, 4 }
 0x233   :  { %v1299_v2 = vmax.f32 %v1297_v21, %v1298_v25  ;;  %v1296_v18 = vmax.f32 %v1294_v53, %v1295_v3  ;;  %v2707_v53 = vld [vmem:[#allocation19_spill] sm:$0xff]  ;;  %v652_v21 = vrot.slane %v2182_v38, 2 }
 0x234   :  { %v1163_v12 = vadd.f32 %v2707_v53, %v1115_v8  ;;  %v1332_v8 = vld [vmem:[%s2687_s4 + $0x70] sm:$0xff] }
 0x235   :  { %v1300_v63 = vrot.slane %v1299_v2, 2  ;;  %v1474_v6 = vsel %vm1373_vm5, %v1296_v18, %v1473_v41  ;;  %v636_v41 = vrot.slane %v616_v40, 1  ;;  %v674_v40 = vsel %vm673_vm10, %v665_v27, 0.0  ;;  %v1343_v53 = vld [vmem:[#allocation9] sm:$0xff] }
 0x236   :  { %v1228_v61 = vpop.permute.xlu1 %1227  ;;  %v683_v49 = vsel %vm682_vm11, %v674_v40, -inf }
 0x237   :  { %v1301_v31 = vmax.f32 %v1299_v2, %v1300_v63  ;;  %v644_v55 = vadd.f32 %v636_v41, %v2176_v35  ;;  %v1350_v35 = vld [vmem:[#allocation9 + $0x38] sm:$0xff]  ;;  %v639_v2 = vrot.slane %v622_v33, 1  ;;  %v684_v1 = vrot.slane %v683_v49, 4 }
 0x238   :  { %1411 = vmatpush.msrb.mxu3 %v1350_v35 }
 0x239   :  { %v1302_v17 = vrot.slane %v1301_v31, 1  ;;  %v685_v35 = vmax.f32 %v683_v49, %v684_v1 }
 0x23b   :  { %v1303_v51 = vmax.f32 %v1301_v31, %v1302_v17  ;;  %v1349_v31 = vld [vmem:[#allocation9 + $0x30] sm:$0xff] }
 0x23c   :  { %1412 = vmatpush.msrb.mxu3 %v1349_v31  ;;  %v1329_v31 = vld [vmem:[%s2687_s4 + $0x58] sm:$0xff] }
 0x23d   :  { %v2474_v43 = vsel %vm1375_vm6, %v1303_v51, %v1474_v6  ;;  %v1321_v6 = vld [vmem:[%s2687_s4 + $0x18] sm:$0xff] }
 0x23e   :  { %v614_v26 = vpop.permute.xlu1 %613  ;;  %v1348_v51 = vld [vmem:[#allocation9 + $0x28] sm:$0xff] }
 0x23f   :  { %v635_v62 = vrot.slane %v614_v26, 1  ;;  %v1100_v16 = vpop.permute.xlu0 %1099  ;;  %1413 = vmatpush.msrb.mxu3 %v1348_v51 }
 0x240   :  { %v1116_v0 = vadd.f32 %v1100_v16, %v1036_v39  ;;  %v647_v39 = vadd.f32 %v639_v2, %v2205_v52 }
 0x241   :  { %v643_v30 = vadd.f32 %v635_v62, %v2166_v29  ;;  %v1322_v29 = vld [vmem:[%s2687_s4 + $0x20] sm:$0xff]  ;;  %1414 = vmatpush.msrb.mxu3 %v1347_v19 }
 0x242   :  { %v1164_v14 = vadd.f32 %v2706_v56, %v1116_v0  ;;  %1394 = vmatpush.msrb.mxu2 %v1322_v29  ;;  %v1318_v0 = vld [vmem:[%s2687_s4] sm:$0xff]  ;;  %v663_v56 = vadd.f32 %v655_v50, %v647_v39  ;;  %v1327_v39 = vld [vmem:[%s2687_s4 + $0x48] sm:$0xff] }
 0x243   :  { %v659_v3 = vadd.f32 %v651_v11, %v643_v30  ;;  %1415 = vmatpush.msrb.mxu3 %v1346_v4  ;;  %v650_v30 = vrot.slane %v2708_v20, 2  ;;  %v1344_v11 = vld [vmem:[#allocation9 + $0x8] sm:$0xff]  ;;  %v1326_v19 = vld [vmem:[%s2687_s4 + $0x40] sm:$0xff] }
 0x244   :  { %v1244_v57 = vadd.f32 %v1228_v61, %v1164_v14  ;;  %v660_v61 = vadd.f32 %v652_v21, %v644_v55  ;;  %1395 = vmatpush.msrb.mxu2 %v1321_v6  ;;  %v1331_v55 = vld [vmem:[%s2687_s4 + $0x68] sm:$0xff]  ;;  %v671_v21 = vmax.f32 %v663_v56, 0.0  ;;  %v653_v6 = vrot.slane %v2192_v44, 2 }
 0x245   :  { %v667_v28 = vmax.f32 %v659_v3, 0.0  ;;  %1416 = vmatpush.msrb.mxu3 %v1345_v13  ;;  %v1341_v13 = vld [vmem:[%s2687_s4 + $0xb8] sm:$0xff] }
 0x246   :  { %v1252_v37 = vmax.f32 %v1244_v57, 0.0  ;;  %v620_v60 = vpop.permute.xlu1 %619  ;;  %1396 = vmatpush.msrb.mxu2 %v1320_v46  ;;  %v668_v62 = vmax.f32 %v660_v61, 0.0 }
 0x247   :  { %v638_v25 = vrot.slane %v620_v60, 1  ;;  %v1226_v32 = vpop.permute.xlu0 %1225  ;;  %v676_v5 = vsel %vm673_vm10, %v667_v28, 0.0  ;;  %1417 = vmatpush.msrb.mxu3 %v1344_v11 }
 0x248   :  { %v1261_v18 = vsel %vm1253_vm9, %v1252_v37, 0.0  ;;  %v1243_v63 = vadd.f32 %v1226_v32, %v1163_v12  ;;  %1397 = vmatpush.msrb.mxu2 %v1319_v9  ;;  %v677_v57 = vsel %vm673_vm10, %v668_v62, 0.0  ;;  %v697_v33 = vsel %vm682_vm11, %v676_v5, -inf  ;;  %v1330_v12 = vld [vmem:[%s2687_s4 + $0x60] sm:$0xff] }
 0x249   :  { %v1311_v38 = vsel %vm932_vm1, %v1261_v18, -inf  ;;  %v646_v36 = vadd.f32 %v638_v25, %v2197_v47  ;;  %v704_v29 = vsel %vm682_vm11, %v677_v57, -inf  ;;  %v698_v25 = vrot.slane %v697_v33, 4  ;;  %1418 = vmatpush.msrb.mxu3 %v1343_v53  ;;  %v1338_v53 = vld [vmem:[%s2687_s4 + $0xa0] sm:$0xff] }
 0x24a   :  { %v1312_v23 = vrot.slane %v1311_v38, 4  ;;  %v1251_v17 = vmax.f32 %v1243_v63, 0.0  ;;  %1398 = vmatpush.msrb.mxu2 %v1318_v0  ;;  %v1342_v63 = vld [vmem:[#allocation3] sm:$0xff]  ;;  %v705_v61 = vrot.slane %v704_v29, 4 }
 0x24b   :  { %v662_v15 = vadd.f32 %v654_v45, %v646_v36  ;;  %1419 = vmatmul.f32.vlgmr.msrb.gmra.mxu3 %v1342_v63  ;;  %v680_v36 = vsel %vm673_vm10, %v671_v21, 0.0  ;;  %v699_v44 = vmax.f32 %v697_v33, %v698_v25 }
 0x24c   :  { %v1260_v47 = vsel %vm1253_vm9, %v1251_v17, 0.0  ;;  %v1313_v26 = vmax.f32 %v1311_v38, %v1312_v23  ;;  %1450 = vmatpush.msra.mxu2 %v1333_v54  ;;  %v1328_v23 = vld [vmem:[%s2687_s4 + $0x50] sm:$0xff]  ;;  %v706_v62 = vmax.f32 %v704_v29, %v705_v61  ;;  %v725_v49 = vsel %vm682_vm11, %v680_v36, -inf  ;;  %1490 = vmatpush.msra.mxu3 %v1341_v13 }
 0x24d   :  { %v1304_v16 = vsel %vm932_vm1, %v1260_v47, -inf  ;;  %v670_v34 = vmax.f32 %v662_v15, 0.0  ;;  %v686_v47 = vrot.slane %v685_v35, 2  ;;  %v726_v5 = vrot.slane %v725_v49, 4  ;;  %v1524_v13 = vld [vmem:[%s2690_s7 + $0x50] sm:$0xff] }
 0x24e   :  { %v1305_v52 = vrot.slane %v1304_v16, 4  ;;  %v1314_v7 = vrot.slane %v1313_v26, 2  ;;  %1451 = vmatpush.msra.mxu2 %v1332_v8  ;;  %v707_v54 = vrot.slane %v706_v62, 2  ;;  %v1340_v8 = vld [vmem:[%s2687_s4 + $0xb0] sm:$0xff] }
 0x24f   :  { %v612_v41 = vpop.permute.xlu0 %611  ;;  %v687_v0 = vmax.f32 %v685_v35, %v686_v47  ;;  %1491 = vmatpush.msra.mxu3 %v1340_v8  ;;  %v1523_v8 = vld [vmem:[%s2690_s7 + $0x48] sm:$0xff] }
 0x250   :  { %v1306_v14 = vmax.f32 %v1304_v16, %v1305_v52  ;;  %v634_v48 = vrot.slane %v612_v41, 1  ;;  %v1315_v22 = vmax.f32 %v1313_v26, %v1314_v7  ;;  %1452 = vmatpush.msra.mxu2 %v1331_v55 }
 0x251   :  { %v688_v11 = vrot.slane %v687_v0, 1 }
 0x252   :  { %v1307_v37 = vrot.slane %v1306_v14, 2  ;;  %v642_v60 = vadd.f32 %v634_v48, %v2159_v24  ;;  %v1316_v32 = vrot.slane %v1315_v22, 1  ;;  %v679_v24 = vsel %vm673_vm10, %v670_v34, 0.0  ;;  %1453 = vmatpush.msra.mxu2 %v1330_v12 }
 0x253   :  { %v718_v28 = vsel %vm682_vm11, %v679_v24, -inf  ;;  %v689_v25 = vmax.f32 %v687_v0, %v688_v11  ;;  %v1514_v11 = vld [vmem:[%s2690_s7] sm:$0xff] }
 0x254   :  { %v1308_v27 = vmax.f32 %v1306_v14, %v1307_v37  ;;  %v658_v3 = vadd.f32 %v650_v30, %v642_v60  ;;  %1454 = vmatpush.msra.mxu2 %v1329_v31  ;;  %v1317_v45 = vmax.f32 %v1315_v22, %v1316_v32  ;;  %v719_v15 = vrot.slane %v718_v28, 4  ;;  %v1339_v22 = vld [vmem:[%s2687_s4 + $0xa8] sm:$0xff] }
 0x255   :  { %v656_v30 = vrot.slane %v2218_v59, 2  ;;  %v708_v37 = vmax.f32 %v706_v62, %v707_v54  ;;  %v727_v60 = vmax.f32 %v725_v49, %v726_v5  ;;  %1492 = vmatpush.msra.mxu3 %v1339_v22  ;;  %v1527_v54 = vld [vmem:[%s2690_s7 + $0x68] sm:$0xff]  ;;  %v1526_v5 = vld [vmem:[%s2690_s7 + $0x60] sm:$0xff] }
 0x256   :  { %v1309_v2 = vrot.slane %v1308_v27, 1  ;;  %v666_v18 = vmax.f32 %v658_v3, 0.0  ;;  %1455 = vmatpush.msra.mxu2 %v1328_v23  ;;  %v720_v56 = vmax.f32 %v718_v28, %v719_v15  ;;  %v1337_v3 = vld [vmem:[%s2687_s4 + $0x98] sm:$0xff]  ;;  %v1335_v23 = vld [vmem:[%s2687_s4 + $0x88] sm:$0xff] }
 0x257   :  { %v618_v38 = vpop.permute.xlu0 %617  ;;  %1493 = vmatpush.msra.mxu3 %v1338_v53  ;;  %v709_v35 = vrot.slane %v708_v37, 1  ;;  %v728_v24 = vrot.slane %v727_v60, 2  ;;  %v1515_v22 = vld [vmem:[%s2690_s7 + $0x8] sm:$0xff]  ;;  %v1916_v53 = vld [vmem:[%s2688_s5] ss:$0 sm:$0xff] }
 0x258   :  { %v675_v17 = vsel %vm673_vm10, %v666_v18, 0.0  ;;  %v637_v46 = vrot.slane %v618_v38, 1  ;;  %v1310_v40 = vmax.f32 %v1308_v27, %v1309_v2  ;;  %1456 = vmatpush.msra.mxu2 %v1327_v39  ;;  %v721_v59 = vrot.slane %v720_v56, 2  ;;  %v1336_v2 = vld [vmem:[%s2687_s4 + $0x90] sm:$0xff] }
 0x259   :  { %v690_v51 = vsel %vm682_vm11, %v675_v17, -inf  ;;  %1494 = vmatpush.msra.mxu3 %v1337_v3 }
 0x25a   :  { %v691_v26 = vrot.slane %v690_v51, 4  ;;  %v645_v9 = vadd.f32 %v637_v46, %v2187_v42  ;;  %v1476_v50 = vsel %vm1377_vm7, %v1310_v40, %v2474_v43  ;;  %v700_v42 = vrot.slane %v699_v44, 2  ;;  %1457 = vmatpush.msra.mxu2 %v1326_v19 }
 0x25b   :  { %v1477_v16 = vsel %vm1379_vm8, %v1317_v45, %v1476_v50  ;;  %v722_v18 = vmax.f32 %v720_v56, %v721_v59  ;;  %1495 = vmatpush.msra.mxu3 %v1336_v2  ;;  %v729_v46 = vmax.f32 %v727_v60, %v728_v24  ;;  %v1522_v56 = vld [vmem:[%s2690_s7 + $0x40] sm:$0xff] }
 0x25c   :  { %v692_v52 = vmax.f32 %v690_v51, %v691_v26  ;;  %v661_v7 = vadd.f32 %v653_v6, %v645_v9  ;;  %1478 = vrot.lane.b32.xlu2 %v1477_v16, %s2053_s13  ;;  %v701_v1 = vmax.f32 %v699_v44, %v700_v42  ;;  %v710_v44 = vmax.f32 %v708_v37, %v709_v35  ;;  %v1919_v35 = vld [vmem:[%s2692_s9] ss:$0 sm:$0xff] }
 0x25d   :  { %v723_v28 = vrot.slane %v722_v18, 1  ;;  %1496 = vmatpush.msra.mxu3 %v1335_v23  ;;  %v730_v26 = vrot.slane %v729_v46, 1 }
 0x25e   :  { %v693_v4 = vrot.slane %v692_v52, 2  ;;  %v669_v43 = vmax.f32 %v661_v7, 0.0  ;;  %v702_v27 = vrot.slane %v701_v1, 1 }
 0x25f   :  { %v624_v41 = vpop.permute.xlu0 %623  ;;  %1497 = vmatpush.msra.mxu3 %v1334_v10  ;;  %v724_v50 = vmax.f32 %v722_v18, %v723_v28  ;;  %v731_v49 = vmax.f32 %v729_v46, %v730_v26 }
 0x260   :  { %v694_v14 = vmax.f32 %v692_v52, %v693_v4  ;;  %v678_v48 = vsel %vm673_vm10, %v669_v43, 0.0  ;;  %v640_v20 = vrot.slane %v624_v41, 1  ;;  %v703_v38 = vmax.f32 %v701_v1, %v702_v27  ;;  %v1529_v4 = vld [vmem:[%s2690_s7 + $0x78] sm:$0xff]  ;;  %v1528_v43 = vld [vmem:[%s2690_s7 + $0x70] sm:$0xff] }
 0x261   :  { %v711_v57 = vsel %vm682_vm11, %v678_v48, -inf  ;;  %v1525_v41 = vld [vmem:[%s2690_s7 + $0x58] sm:$0xff]  ;;  %v1520_v48 = vld [vmem:[%s2690_s7 + $0x30] sm:$0xff] }
 0x262   :  { %v695_v55 = vrot.slane %v694_v14, 1  ;;  %v712_v33 = vrot.slane %v711_v57, 4  ;;  %v648_v34 = vadd.f32 %v640_v20, %v2215_v58  ;;  %v1519_v20 = vld [vmem:[%s2690_s7 + $0x28] sm:$0xff]  ;;  %v1517_v1 = vld [vmem:[%s2690_s7 + $0x18] sm:$0xff] }
 0x264   :  { %v696_v12 = vmax.f32 %v694_v14, %v695_v55  ;;  %v713_v29 = vmax.f32 %v711_v57, %v712_v33  ;;  %v664_v21 = vadd.f32 %v656_v30, %v648_v34  ;;  %v1521_v14 = vld [vmem:[%s2690_s7 + $0x38] sm:$0xff]  ;;  %v1518_v30 = vld [vmem:[%s2690_s7 + $0x20] sm:$0xff]  ;;  %v1516_v57 = vld [vmem:[%s2690_s7 + $0x10] sm:$0xff] }
 0x266   :  { %v714_v32 = vrot.slane %v713_v29, 2  ;;  %v672_v58 = vmax.f32 %v664_v21, 0.0  ;;  %v1368_v61 = vsel %vm1367_vm2, %v696_v12, %v689_v25  ;;  %v1562_v25 = vld [vmem:[#allocation2] sm:$0x1] }
 0x267   :  { %v1370_v40 = vsel %vm1369_vm3, %v703_v38, %v1368_v61 }
 0x268   :  { %v715_v63 = vmax.f32 %v713_v29, %v714_v32  ;;  %v681_v6 = vsel %vm673_vm10, %v672_v58, 0.0  ;;  %v1372_v47 = vsel %vm1371_vm4, %v710_v44, %v1370_v40  ;;  %v1917_v29 = vld [vmem:[%s2689_s6] ss:$0 sm:$0xff]  ;;  %v2062_v32 = vmov 0  }
 0x269   :  { %v732_v31 = vsel %vm682_vm11, %v681_v6, -inf  ;;  %1915 = vset.pattern.permute.xlu0 %v2062_v32  ;;  %v1918_v58 = vld [vmem:[%s2691_s8] ss:$0 sm:$0xff]  ;;  %s2063_s8 = smov [#allocation11]  }
 0x26a   :  { %v716_v36 = vrot.slane %v715_v63, 1  ;;  %v733_v17 = vrot.slane %v732_v31, 4  ;;  %v1439_v42 = vpop.permute.xlu1 %1438  ;;  %1565 = vperm.xlu0 %1915, %v1562_v25   ;;  %v1561_v6 = vld [vmem:[%s2693_s10] sm:$0x1]  ;;  %s1623_s9 = sshll.u32 %s2063_s8, 4  ;;  %s1624_s9 = int_to_ptr.vmem [resolvable:$true] %s1623_s9 }
 0x26c   :  { %v717_v51 = vmax.f32 %v715_v63, %v716_v36  ;;  %v734_v45 = vmax.f32 %v732_v31, %v733_v17 }
 0x26e   :  { %v735_v39 = vrot.slane %v734_v45, 2  ;;  %v1374_v9 = vsel %vm1373_vm5, %v717_v51, %v1372_v47 }
 0x26f   :  { %v1376_v19 = vsel %vm1375_vm6, %v724_v50, %v1374_v9 }
 0x270   :  { %v736_v62 = vmax.f32 %v734_v45, %v735_v39  ;;  %v1378_v52 = vsel %vm1377_vm7, %v731_v49, %v1376_v19 }
 0x272   :  { %v737_v16 = vrot.slane %v736_v62, 1 }
 0x274   :  { %v738_v15 = vmax.f32 %v736_v62, %v737_v16 }
 0x276   :  { %v1380_v7 = vsel %vm1379_vm8, %v738_v15, %v1378_v52 }
 0x277   :  { %1845 = vmatmul.msk.f32.vlgmr.msrb.gmra.mxu2 %vm682_vm11, %v1380_v7 }
 0x278   :  { %1530 = vmatpush.msrb.mxu2 %v1529_v4 }
 0x27a   :  { %1531 = vmatpush.msrb.mxu2 %v1528_v43 }
 0x27c   :  { %1532 = vmatpush.msrb.mxu2 %v1527_v54 }
 0x27e   :  { %1533 = vmatpush.msrb.mxu2 %v1526_v5 }
 0x27f   :  { %1846 = vmatmul.msk.f32.vlgmr.msra.gmra.mxu2 %vm682_vm11, %v1439_v42 }
 0x280   :  { %1534 = vmatpush.msrb.mxu2 %v1525_v41 }
 0x282   :  { %1535 = vmatpush.msrb.mxu2 %v1524_v13 }
 0x284   :  { %1536 = vmatpush.msrb.mxu2 %v1523_v8 }
 0x286   :  { %1537 = vmatpush.msrb.mxu2 %v1522_v56 }
 0x288   :  { %1538 = vmatpush.msrb.mxu2 %v1521_v14 }
 0x28a   :  { %1539 = vmatpush.msrb.mxu2 %v1520_v48 }
 0x28c   :  { %1540 = vmatpush.msrb.mxu2 %v1519_v20 }
 0x28e   :  { %1541 = vmatpush.msrb.mxu2 %v1518_v30 }
 0x290   :  { %1542 = vmatpush.msrb.mxu2 %v1517_v1 }
 0x292   :  { %1543 = vmatpush.msrb.mxu2 %v1516_v57 }
 0x294   :  { %1544 = vmatpush.msrb.mxu2 %v1515_v22 }
 0x296   :  { %1545 = vmatpush.msrb.mxu2 %v1514_v11 }
 0x2b6   :  { %v1479_v0 = vpop.permute.xlu2 %1478 }
 0x2b7   :  { %1847 = vmatmul.msk.f32.vlgmr.msra.gmra.mxu3 %vm682_vm11, %v1479_v0 }
 0x2ce   :  { %v1420_v33 = vpop.f32.mrf.mxu3 }
 0x2dc   :  { %v1566_v61 = vpop.permute.xlu0 %1565 }
 0x2dd   :  { %v1568_v38 = vperm.slane %v1566_v61, 0 }
 0x2fa   :  { %v1400_v55 = vpop.f32.mrf.mxu2 }
 0x2fb   :  { %v1421_v37 = vadd.f32 %v1420_v33, %v1400_v55 }
 0x302   :  { %v1459_v34 = vpop.f32.mrf.mxu2 }
 0x303   :  { %v1462_v60 = vadd.f32 %v1459_v34, %v1421_v37 }
 0x33a   :  { %v1499_v59 = vpop.f32.mrf.mxu3 }
 0x33b   :  { %v1502_v12 = vadd.f32 %v1499_v59, %v1462_v60 }
 0x33d   :  { %v1507_v21 = vmul.f32 %v1916_v53, %v1502_v12 }
 0x33f   :  { %v1512_v27 = vadd.f32 %v1917_v29, %v1507_v21 }
 0x341   :  { %v1513_v3 = vmax.f32 %v1512_v27, 0.0 }
 0x343   :  { %1546 = vmatmul.f32.vlgmr.msrb.gmra.mxu2 %v1513_v3 }
 0x3c6   :  { %v1547_v24 = vpop.f32.mrf.mxu2 }
 0x3c7   :  { %v1554_v2 = vmul.f32 %v1918_v58, %v1547_v24 }
 0x3c9   :  { %v1559_v18 = vadd.f32 %v1919_v35, %v1554_v2 }
 0x3cb   :  { %v1560_v63 = vmax.f32 %v1559_v18, 0.0 }
 0x3cd   :  { %1848 = vmatpush.xpose.msk.msrb.mxu3 %vm682_vm11, %v1560_v63 }
 0x3d0   :  { %1849 = vmatmul.msk.f32.vlgmr.msrb.gmra.mxu3 %vm682_vm11, %v1561_v6 }
 0x453   :  { %v1592_v31 = vpop.f32.mrf.mxu3 }
 0x454   :  { %v1593_v23 = vadd.f32 %v1592_v31, %v1568_v38 }
 0x456   :  { %v1850_v36 = vmul.f32 -1.442695, %v1593_v23 }
 0x458   :  { %1920 = vpow2.f32 %v1850_v36 }
 0x45e   :  { %v1921_v17 = vpop.eup %1920 }
 0x45f   :  { %v1598_v46 = vadd.f32 1.0, %v1921_v17 }
 0x461   :  { %1922 = vrcp.f32 %v1598_v46  ;;  %v1610_v28 = vand.u32 2147483648, %v1598_v46  ;;  %v1608_v45 = vand.u32 2147483647, %v1598_v46  ;;  %vm1604_vm13 = vweird.f32 %v1598_v46 }
 0x463   :  { %v1611_v47 = vor.u32 1.1754944e-38, %v1610_v28  ;;  %vm1609_vm15 = vcmp.eq.f32.partialorder %v1608_v45, 8.507059e+37 }
 0x467   :  { %v1923_v40 = vpop.eup %1922 }
 0x468   :  { %v1600_v10 = vmul.f32 %v1923_v40, %v1598_v46  ;;  %vm1605_vm12 = vweird.f32 %v1923_v40 }
 0x469   :  { %vm1606_vm14 = vmor %vm1604_vm13, %vm1605_vm12 }
 0x46a   :  { %v1601_v44 = vsub.f32 1.0, %v1600_v10 }
 0x46c   :  { %v1602_v51 = vmul.f32 %v1923_v40, %v1601_v44 }
 0x46e   :  { %v1603_v39 = vadd.f32 %v1923_v40, %v1602_v51 }
 0x470   :  { %v1607_v26 = vsel %vm1606_vm14, %v1923_v40, %v1603_v39 }
 0x471   :  { %v1612_v9 = vsel %vm1609_vm15, %v1611_v47, %v1607_v26 }
 0x472   :  { %v1614_v50 = vmul.f32 4.0, %v1612_v9 }
 0x474   :  { %v1615_v62 = vadd.f32 1.0, %v1614_v50 }
 0x476   :  { %1617 = vst.msk [vmem:[#allocation11] sm:$0x1] %vm1616_vm0, %v1615_v62 }
 0x477   :  { %1628 = dma.vmem_to_hbm [thread:$0]  %s1624_s9, 16, %s1626_s23, [#allocation5]  }
 0x478   :  { %2050 = dma.done.wait [#allocation5], 16  }
 0x479   :  { %2051 = vsyncadd [#allocation5], 4294967280 }
 0x47a   :  { %1633 = vsyncpa [#allocation4], 1 }
 0x47b   :  { %1634 = vsyncpa [#allocation7], 1 }
 0x47c   :  { %1635 = vsyncpa [#allocation10], 1 }
 0x47d   :  { %1636 = vsyncpa [#allocation5], 1 }

</bundles_post_ra>
